<compile_context>
chip_gen: v5e
topology: v5e:2x2
jax: 0.10.0
libtpu: 0.0.40
codegen_flags: <defaults>
</compile_context>

<pallas_src>
import functools
import math

import jax
import jax.numpy as jnp
from jax import lax
from jax.experimental import pallas as pl
from jax.experimental.pallas import tpu as pltpu


def _mhsa_kernel(x_ref, wqkv_ref, bqkv_ref, o_ref, *,
                 batch, n, dim_k, dim_v, num_heads):
    # x_ref   : (batch*n, dim_in)        -- batch folded into rows
    # wqkv_ref: (dim_in, 2*dim_k+dim_v)  -- fused Q|K|V weights, 1/sqrt(dk) folded into Q cols
    # bqkv_ref: (1, 2*dim_k+dim_v)       -- fused biases (Q part pre-scaled)
    # o_ref   : (batch*n, dim_v)         -- output in PyTorch layout (heads concat on last dim)
    dk = dim_k // num_heads
    dv = dim_v // num_heads

    x = x_ref[...]                                                         # (batch*n, dim_in)

    # Single fused projection matmul for all rows of all batch elements.
    qkv = (jnp.dot(x, wqkv_ref[...], preferred_element_type=jnp.float32)
           + bqkv_ref[...])                                                # (batch*n, 2*dim_k+dim_v)
    q = qkv[:, :dim_k]                                                     # (batch*n, dim_k) -- pre-scaled
    k = qkv[:, dim_k:2 * dim_k]                                            # (batch*n, dim_k)
    v = qkv[:, 2 * dim_k:]                                                 # (batch*n, dim_v)

    # Static unroll over (batch, head); attention stays within each batch element's rows.
    for b in range(batch):
        r0, r1 = b * n, (b + 1) * n
        qb, kb, vb = q[r0:r1], k[r0:r1], v[r0:r1]                          # (n, dim_k/_v)
        for h in range(num_heads):
            qh = qb[:, h * dk:(h + 1) * dk]                                # (n, dk)
            kh = kb[:, h * dk:(h + 1) * dk]                                # (n, dk)
            vh = vb[:, h * dv:(h + 1) * dv]                                # (n, dv)

            # q @ k^T without materializing k.T; softmax scale already folded into q.
            s = lax.dot_general(qh, kh, (((1,), (1,)), ((), ())),
                                preferred_element_type=jnp.float32)        # (n, n)

            # Numerically stable softmax over the last axis (exact divide; matches torch).
            s = s - jnp.max(s, axis=-1, keepdims=True)
            p = jnp.exp(s)
            p = p / jnp.sum(p, axis=-1, keepdims=True)

            # Direct static-slice write: equivalent to transpose(1,2).reshape(b, n, dim_v).
            o_ref[r0:r1, h * dv:(h + 1) * dv] = jnp.dot(
                p, vh, preferred_element_type=jnp.float32).astype(o_ref.dtype)


def fuse_qkv_params(wq, bq, wk, bk, wv, bv, num_heads):
    """One-time (module-init) fusion of PyTorch-style (dim_out, dim_in) weights / (dim_out,) biases.

    Returns W_qkv of shape (dim_in, 2*dim_k + dim_v) and b_qkv of shape (1, 2*dim_k + dim_v),
    laid out so that x @ W_qkv == [linear_q(x) * norm | linear_k(x) | linear_v(x)],
    i.e. the 1/sqrt(dim_k // num_heads) softmax scale is folded into the Q projection.
    """
    dim_k = wq.shape[0]
    scale = 1.0 / math.sqrt(dim_k // num_heads)
    w_qkv = jnp.concatenate([wq.T * scale, wk.T, wv.T], axis=1)
    b_qkv = jnp.concatenate([bq * scale, bk, bv]).reshape(1, -1)
    return w_qkv, b_qkv


def multi_head_self_attention(x, w_qkv, b_qkv, dim_k, dim_v, num_heads):
    """x: (batch, n, dim_in); w_qkv: (dim_in, 2*dim_k+dim_v); b_qkv: (1, 2*dim_k+dim_v)."""
    batch, n, dim_in = x.shape
    dtot = 2 * dim_k + dim_v
    assert w_qkv.shape == (dim_in, dtot) and b_qkv.shape == (1, dtot)
    rows = batch * n

    # Fold batch into rows (free contiguous reshape) so the whole call is one grid step.
    x2 = x.reshape(rows, dim_in)

    kernel = functools.partial(_mhsa_kernel, batch=batch, n=n,
                               dim_k=dim_k, dim_v=dim_v, num_heads=num_heads)

    out = pl.pallas_call(
        kernel,
        out_shape=jax.ShapeDtypeStruct((rows, dim_v), x.dtype),
        grid_spec=pltpu.PrefetchScalarGridSpec(
            num_scalar_prefetch=0,
            grid=(1,),                                              # single step: everything resident
            in_specs=[
                pl.BlockSpec((rows, dim_in), lambda i: (0, 0)),     # all activations
                pl.BlockSpec((dim_in, dtot), lambda i: (0, 0)),     # fused W (one ~24 KB DMA)
                pl.BlockSpec((1, dtot), lambda i: (0, 0)),          # fused bias
            ],
            out_specs=pl.BlockSpec((rows, dim_v), lambda i: (0, 0)),
        ),
        compiler_params=pltpu.CompilerParams(
            dimension_semantics=("arbitrary",)),
    )(x2, w_qkv, b_qkv)

    return out.reshape(batch, n, dim_v)


def _reference(x, wq, bq, wk, bk, wv, bv, num_heads):
    batch, n, dim_in = x.shape
    dim_k, dim_v = wq.shape[0], wv.shape[0]
    nh, dk, dv = num_heads, dim_k // num_heads, dim_v // num_heads
    q = (x @ wq.T + bq).reshape(batch, n, nh, dk).transpose(0, 2, 1, 3)
    k = (x @ wk.T + bk).reshape(batch, n, nh, dk).transpose(0, 2, 1, 3)
    v = (x @ wv.T + bv).reshape(batch, n, nh, dv).transpose(0, 2, 1, 3)
    dist = jnp.einsum("bhqd,bhkd->bhqk", q, k) * (1.0 / math.sqrt(dk))
    dist = jax.nn.softmax(dist, axis=-1)
    att = jnp.einsum("bhqk,bhkd->bhqd", dist, v)
    return att.transpose(0, 2, 1, 3).reshape(batch, n, dim_v)


if __name__ == "__main__":
    # Small shapes consistent with the module's forward: x (batch, n, dim_in)
    batch, n, dim_in = 2, 16, 32
    dim_k, dim_v, num_heads = 64, 64, 4

    key = jax.random.PRNGKey(0)
    ks = jax.random.split(key, 7)
    bound = 1.0 / math.sqrt(dim_in)  # nn.Linear default uniform bound

    x  = jax.random.normal(ks[0], (batch, n, dim_in), dtype=jnp.float32)
    wq = jax.random.uniform(ks[1], (dim_k, dim_in), minval=-bound, maxval=bound, dtype=jnp.float32)
    bq = jax.random.uniform(ks[2], (dim_k,), minval=-bound, maxval=bound, dtype=jnp.float32)
    wk = jax.random.uniform(ks[3], (dim_k, dim_in), minval=-bound, maxval=bound, dtype=jnp.float32)
    bk = jax.random.uniform(ks[4], (dim_k,), minval=-bound, maxval=bound, dtype=jnp.float32)
    wv = jax.random.uniform(ks[5], (dim_v, dim_in), minval=-bound, maxval=bound, dtype=jnp.float32)
    bv = jax.random.uniform(ks[6], (dim_v,), minval=-bound, maxval=bound, dtype=jnp.float32)

    # One-time parameter fusion + scale folding (module init), hoisted out of the forward path.
    w_qkv, b_qkv = fuse_qkv_params(wq, bq, wk, bk, wv, bv, num_heads)
    w_qkv, b_qkv = jax.block_until_ready((w_qkv, b_qkv))

    fwd = jax.jit(functools.partial(multi_head_self_attention,
                                    dim_k=dim_k, dim_v=dim_v, num_heads=num_heads))
    out = jax.block_until_ready(fwd(x, w_qkv, b_qkv))

    ref = _reference(x, wq, bq, wk, bk, wv, bv, num_heads)
    assert out.shape == (batch, n, dim_v)
    assert jnp.allclose(out, ref, atol=1e-4, rtol=1e-4), "mismatch vs pure-JAX reference"

    print("KERNEL_OK")
</pallas_src>

<mosaic_0001>
module attributes {stable_mosaic.version = 11 : i64} {
  func.func @_mhsa_kernel(%arg0: i32, %arg1: memref<32x32xf32, #tpu.memory_space<vmem>>, %arg2: memref<32x192xf32, #tpu.memory_space<vmem>>, %arg3: memref<1x192xf32, #tpu.memory_space<vmem>>, %arg4: memref<32x64xf32, #tpu.memory_space<vmem>>) attributes {dimension_semantics = [#tpu.dimension_semantics<arbitrary>], iteration_bounds = array<i64: 1>, scalar_prefetch = 0 : i64, scratch_operands = 0 : i64, tpu.core_type = #tpu.core_type<tc>, window_params = [{pipeline_mode = #tpu.pipeline_mode<synchronous>, transform_indices = @transform_0, window_bounds = array<i64: 32, 32>}, {pipeline_mode = #tpu.pipeline_mode<synchronous>, transform_indices = @transform_1, window_bounds = array<i64: 32, 192>}, {pipeline_mode = #tpu.pipeline_mode<synchronous>, transform_indices = @transform_2, window_bounds = array<i64: 1, 192>}, {pipeline_mode = #tpu.pipeline_mode<synchronous>, transform_indices = @transform_3, window_bounds = array<i64: 32, 64>}]} {
    %c0 = arith.constant 0 : index
    %c0_0 = arith.constant 0 : index
    %0 = vector.load %arg1[%c0, %c0_0] : memref<32x32xf32, #tpu.memory_space<vmem>>, vector<32x32xf32>
    %c0_1 = arith.constant 0 : index
    %c0_2 = arith.constant 0 : index
    %1 = vector.load %arg2[%c0_1, %c0_2] : memref<32x192xf32, #tpu.memory_space<vmem>>, vector<32x192xf32>
    %cst = arith.constant dense<0.000000e+00> : vector<32x192xf32>
    %2 = tpu.matmul %0, %1, %cst {dimension_numbers = #tpu.dot_dimension_numbers<[1], [0], [0], [1], [0, 0, 1, 1], [], []>} : vector<32x32xf32>, vector<32x192xf32>, vector<32x192xf32> -> vector<32x192xf32>
    %c0_3 = arith.constant 0 : index
    %c0_4 = arith.constant 0 : index
    %3 = vector.load %arg3[%c0_3, %c0_4] : memref<1x192xf32, #tpu.memory_space<vmem>>, vector<1x192xf32>
    %4 = vector.broadcast %3 : vector<1x192xf32> to vector<32x192xf32>
    %5 = arith.addf %2, %4 : vector<32x192xf32>
    %6 = vector.extract_strided_slice %5 {offsets = [0, 0], sizes = [32, 64], strides = [1, 1]} : vector<32x192xf32> to vector<32x64xf32>
    %7 = vector.extract_strided_slice %5 {offsets = [0, 64], sizes = [32, 64], strides = [1, 1]} : vector<32x192xf32> to vector<32x64xf32>
    %8 = vector.extract_strided_slice %5 {offsets = [0, 128], sizes = [32, 64], strides = [1, 1]} : vector<32x192xf32> to vector<32x64xf32>
    %9 = vector.extract_strided_slice %6 {offsets = [0, 0], sizes = [16, 64], strides = [1, 1]} : vector<32x64xf32> to vector<16x64xf32>
    %10 = vector.extract_strided_slice %7 {offsets = [0, 0], sizes = [16, 64], strides = [1, 1]} : vector<32x64xf32> to vector<16x64xf32>
    %11 = vector.extract_strided_slice %8 {offsets = [0, 0], sizes = [16, 64], strides = [1, 1]} : vector<32x64xf32> to vector<16x64xf32>
    %12 = vector.extract_strided_slice %9 {offsets = [0, 0], sizes = [16, 16], strides = [1, 1]} : vector<16x64xf32> to vector<16x16xf32>
    %13 = vector.extract_strided_slice %10 {offsets = [0, 0], sizes = [16, 16], strides = [1, 1]} : vector<16x64xf32> to vector<16x16xf32>
    %14 = vector.extract_strided_slice %11 {offsets = [0, 0], sizes = [16, 16], strides = [1, 1]} : vector<16x64xf32> to vector<16x16xf32>
    %cst_5 = arith.constant dense<0.000000e+00> : vector<16x16xf32>
    %15 = tpu.matmul %12, %13, %cst_5 {dimension_numbers = #tpu.dot_dimension_numbers<[1], [1], [0], [0], [0, 0, 1, 0], [], []>} : vector<16x16xf32>, vector<16x16xf32>, vector<16x16xf32> -> vector<16x16xf32>
    %cst_6 = arith.constant dense<0xFF800000> : vector<16xf32>
    %16 = vector.multi_reduction <maximumf>, %15, %cst_6 [1] : vector<16x16xf32> to vector<16xf32>
    %17 = vector.shape_cast %16 : vector<16xf32> to vector<16x1xf32>
    %18 = vector.broadcast %17 : vector<16x1xf32> to vector<16x16xf32>
    %19 = arith.subf %15, %18 : vector<16x16xf32>
    %20 = math.exp %19 : vector<16x16xf32>
    %cst_7 = arith.constant dense<0.000000e+00> : vector<16xf32>
    %21 = vector.multi_reduction <add>, %20, %cst_7 [1] : vector<16x16xf32> to vector<16xf32>
    %22 = vector.shape_cast %21 : vector<16xf32> to vector<16x1xf32>
    %23 = vector.broadcast %22 : vector<16x1xf32> to vector<16x16xf32>
    %24 = arith.divf %20, %23 : vector<16x16xf32>
    %cst_8 = arith.constant dense<0.000000e+00> : vector<16x16xf32>
    %25 = tpu.matmul %24, %14, %cst_8 {dimension_numbers = #tpu.dot_dimension_numbers<[1], [0], [0], [1], [0, 0, 1, 1], [], []>} : vector<16x16xf32>, vector<16x16xf32>, vector<16x16xf32> -> vector<16x16xf32>
    %c0_9 = arith.constant 0 : index
    %c0_10 = arith.constant 0 : index
    %26 = vector.load %arg4[%c0_9, %c0_10] : memref<32x64xf32, #tpu.memory_space<vmem>>, vector<16x16xf32>
    tpu.vector_store %arg4[%c0_9, %c0_10], %25 {strides = array<i32>} : memref<32x64xf32, #tpu.memory_space<vmem>>, vector<16x16xf32>,
    %27 = vector.extract_strided_slice %9 {offsets = [0, 16], sizes = [16, 16], strides = [1, 1]} : vector<16x64xf32> to vector<16x16xf32>
    %28 = vector.extract_strided_slice %10 {offsets = [0, 16], sizes = [16, 16], strides = [1, 1]} : vector<16x64xf32> to vector<16x16xf32>
    %29 = vector.extract_strided_slice %11 {offsets = [0, 16], sizes = [16, 16], strides = [1, 1]} : vector<16x64xf32> to vector<16x16xf32>
    %cst_11 = arith.constant dense<0.000000e+00> : vector<16x16xf32>
    %30 = tpu.matmul %27, %28, %cst_11 {dimension_numbers = #tpu.dot_dimension_numbers<[1], [1], [0], [0], [0, 0, 1, 0], [], []>} : vector<16x16xf32>, vector<16x16xf32>, vector<16x16xf32> -> vector<16x16xf32>
    %cst_12 = arith.constant dense<0xFF800000> : vector<16xf32>
    %31 = vector.multi_reduction <maximumf>, %30, %cst_12 [1] : vector<16x16xf32> to vector<16xf32>
    %32 = vector.shape_cast %31 : vector<16xf32> to vector<16x1xf32>
    %33 = vector.broadcast %32 : vector<16x1xf32> to vector<16x16xf32>
    %34 = arith.subf %30, %33 : vector<16x16xf32>
    %35 = math.exp %34 : vector<16x16xf32>
    %cst_13 = arith.constant dense<0.000000e+00> : vector<16xf32>
    %36 = vector.multi_reduction <add>, %35, %cst_13 [1] : vector<16x16xf32> to vector<16xf32>
    %37 = vector.shape_cast %36 : vector<16xf32> to vector<16x1xf32>
    %38 = vector.broadcast %37 : vector<16x1xf32> to vector<16x16xf32>
    %39 = arith.divf %35, %38 : vector<16x16xf32>
    %cst_14 = arith.constant dense<0.000000e+00> : vector<16x16xf32>
    %40 = tpu.matmul %39, %29, %cst_14 {dimension_numbers = #tpu.dot_dimension_numbers<[1], [0], [0], [1], [0, 0, 1, 1], [], []>} : vector<16x16xf32>, vector<16x16xf32>, vector<16x16xf32> -> vector<16x16xf32>
    %c0_15 = arith.constant 0 : index
    %c16 = arith.constant 16 : index
    %41 = vector.load %arg4[%c0_15, %c16] : memref<32x64xf32, #tpu.memory_space<vmem>>, vector<16x16xf32>
    tpu.vector_store %arg4[%c0_15, %c16], %40 {strides = array<i32>} : memref<32x64xf32, #tpu.memory_space<vmem>>, vector<16x16xf32>,
    %42 = vector.extract_strided_slice %9 {offsets = [0, 32], sizes = [16, 16], strides = [1, 1]} : vector<16x64xf32> to vector<16x16xf32>
    %43 = vector.extract_strided_slice %10 {offsets = [0, 32], sizes = [16, 16], strides = [1, 1]} : vector<16x64xf32> to vector<16x16xf32>
    %44 = vector.extract_strided_slice %11 {offsets = [0, 32], sizes = [16, 16], strides = [1, 1]} : vector<16x64xf32> to vector<16x16xf32>
    %cst_16 = arith.constant dense<0.000000e+00> : vector<16x16xf32>
    %45 = tpu.matmul %42, %43, %cst_16 {dimension_numbers = #tpu.dot_dimension_numbers<[1], [1], [0], [0], [0, 0, 1, 0], [], []>} : vector<16x16xf32>, vector<16x16xf32>, vector<16x16xf32> -> vector<16x16xf32>
    %cst_17 = arith.constant dense<0xFF800000> : vector<16xf32>
    %46 = vector.multi_reduction <maximumf>, %45, %cst_17 [1] : vector<16x16xf32> to vector<16xf32>
    %47 = vector.shape_cast %46 : vector<16xf32> to vector<16x1xf32>
    %48 = vector.broadcast %47 : vector<16x1xf32> to vector<16x16xf32>
    %49 = arith.subf %45, %48 : vector<16x16xf32>
    %50 = math.exp %49 : vector<16x16xf32>
    %cst_18 = arith.constant dense<0.000000e+00> : vector<16xf32>
    %51 = vector.multi_reduction <add>, %50, %cst_18 [1] : vector<16x16xf32> to vector<16xf32>
    %52 = vector.shape_cast %51 : vector<16xf32> to vector<16x1xf32>
    %53 = vector.broadcast %52 : vector<16x1xf32> to vector<16x16xf32>
    %54 = arith.divf %50, %53 : vector<16x16xf32>
    %cst_19 = arith.constant dense<0.000000e+00> : vector<16x16xf32>
    %55 = tpu.matmul %54, %44, %cst_19 {dimension_numbers = #tpu.dot_dimension_numbers<[1], [0], [0], [1], [0, 0, 1, 1], [], []>} : vector<16x16xf32>, vector<16x16xf32>, vector<16x16xf32> -> vector<16x16xf32>
    %c0_20 = arith.constant 0 : index
    %c32 = arith.constant 32 : index
    %56 = vector.load %arg4[%c0_20, %c32] : memref<32x64xf32, #tpu.memory_space<vmem>>, vector<16x16xf32>
    tpu.vector_store %arg4[%c0_20, %c32], %55 {strides = array<i32>} : memref<32x64xf32, #tpu.memory_space<vmem>>, vector<16x16xf32>,
    %57 = vector.extract_strided_slice %9 {offsets = [0, 48], sizes = [16, 16], strides = [1, 1]} : vector<16x64xf32> to vector<16x16xf32>
    %58 = vector.extract_strided_slice %10 {offsets = [0, 48], sizes = [16, 16], strides = [1, 1]} : vector<16x64xf32> to vector<16x16xf32>
    %59 = vector.extract_strided_slice %11 {offsets = [0, 48], sizes = [16, 16], strides = [1, 1]} : vector<16x64xf32> to vector<16x16xf32>
    %cst_21 = arith.constant dense<0.000000e+00> : vector<16x16xf32>
    %60 = tpu.matmul %57, %58, %cst_21 {dimension_numbers = #tpu.dot_dimension_numbers<[1], [1], [0], [0], [0, 0, 1, 0], [], []>} : vector<16x16xf32>, vector<16x16xf32>, vector<16x16xf32> -> vector<16x16xf32>
    %cst_22 = arith.constant dense<0xFF800000> : vector<16xf32>
    %61 = vector.multi_reduction <maximumf>, %60, %cst_22 [1] : vector<16x16xf32> to vector<16xf32>
    %62 = vector.shape_cast %61 : vector<16xf32> to vector<16x1xf32>
    %63 = vector.broadcast %62 : vector<16x1xf32> to vector<16x16xf32>
    %64 = arith.subf %60, %63 : vector<16x16xf32>
    %65 = math.exp %64 : vector<16x16xf32>
    %cst_23 = arith.constant dense<0.000000e+00> : vector<16xf32>
    %66 = vector.multi_reduction <add>, %65, %cst_23 [1] : vector<16x16xf32> to vector<16xf32>
    %67 = vector.shape_cast %66 : vector<16xf32> to vector<16x1xf32>
    %68 = vector.broadcast %67 : vector<16x1xf32> to vector<16x16xf32>
    %69 = arith.divf %65, %68 : vector<16x16xf32>
    %cst_24 = arith.constant dense<0.000000e+00> : vector<16x16xf32>
    %70 = tpu.matmul %69, %59, %cst_24 {dimension_numbers = #tpu.dot_dimension_numbers<[1], [0], [0], [1], [0, 0, 1, 1], [], []>} : vector<16x16xf32>, vector<16x16xf32>, vector<16x16xf32> -> vector<16x16xf32>
    %c0_25 = arith.constant 0 : index
    %c48 = arith.constant 48 : index
    %71 = vector.load %arg4[%c0_25, %c48] : memref<32x64xf32, #tpu.memory_space<vmem>>, vector<16x16xf32>
    tpu.vector_store %arg4[%c0_25, %c48], %70 {strides = array<i32>} : memref<32x64xf32, #tpu.memory_space<vmem>>, vector<16x16xf32>,
    %72 = vector.extract_strided_slice %6 {offsets = [16, 0], sizes = [16, 64], strides = [1, 1]} : vector<32x64xf32> to vector<16x64xf32>
    %73 = vector.extract_strided_slice %7 {offsets = [16, 0], sizes = [16, 64], strides = [1, 1]} : vector<32x64xf32> to vector<16x64xf32>
    %74 = vector.extract_strided_slice %8 {offsets = [16, 0], sizes = [16, 64], strides = [1, 1]} : vector<32x64xf32> to vector<16x64xf32>
    %75 = vector.extract_strided_slice %72 {offsets = [0, 0], sizes = [16, 16], strides = [1, 1]} : vector<16x64xf32> to vector<16x16xf32>
    %76 = vector.extract_strided_slice %73 {offsets = [0, 0], sizes = [16, 16], strides = [1, 1]} : vector<16x64xf32> to vector<16x16xf32>
    %77 = vector.extract_strided_slice %74 {offsets = [0, 0], sizes = [16, 16], strides = [1, 1]} : vector<16x64xf32> to vector<16x16xf32>
    %cst_26 = arith.constant dense<0.000000e+00> : vector<16x16xf32>
    %78 = tpu.matmul %75, %76, %cst_26 {dimension_numbers = #tpu.dot_dimension_numbers<[1], [1], [0], [0], [0, 0, 1, 0], [], []>} : vector<16x16xf32>, vector<16x16xf32>, vector<16x16xf32> -> vector<16x16xf32>
    %cst_27 = arith.constant dense<0xFF800000> : vector<16xf32>
    %79 = vector.multi_reduction <maximumf>, %78, %cst_27 [1] : vector<16x16xf32> to vector<16xf32>
    %80 = vector.shape_cast %79 : vector<16xf32> to vector<16x1xf32>
    %81 = vector.broadcast %80 : vector<16x1xf32> to vector<16x16xf32>
    %82 = arith.subf %78, %81 : vector<16x16xf32>
    %83 = math.exp %82 : vector<16x16xf32>
    %cst_28 = arith.constant dense<0.000000e+00> : vector<16xf32>
    %84 = vector.multi_reduction <add>, %83, %cst_28 [1] : vector<16x16xf32> to vector<16xf32>
    %85 = vector.shape_cast %84 : vector<16xf32> to vector<16x1xf32>
    %86 = vector.broadcast %85 : vector<16x1xf32> to vector<16x16xf32>
    %87 = arith.divf %83, %86 : vector<16x16xf32>
    %cst_29 = arith.constant dense<0.000000e+00> : vector<16x16xf32>
    %88 = tpu.matmul %87, %77, %cst_29 {dimension_numbers = #tpu.dot_dimension_numbers<[1], [0], [0], [1], [0, 0, 1, 1], [], []>} : vector<16x16xf32>, vector<16x16xf32>, vector<16x16xf32> -> vector<16x16xf32>
    %c16_30 = arith.constant 16 : index
    %c0_31 = arith.constant 0 : index
    %89 = vector.load %arg4[%c16_30, %c0_31] : memref<32x64xf32, #tpu.memory_space<vmem>>, vector<16x16xf32>
    tpu.vector_store %arg4[%c16_30, %c0_31], %88 {strides = array<i32>} : memref<32x64xf32, #tpu.memory_space<vmem>>, vector<16x16xf32>,
    %90 = vector.extract_strided_slice %72 {offsets = [0, 16], sizes = [16, 16], strides = [1, 1]} : vector<16x64xf32> to vector<16x16xf32>
    %91 = vector.extract_strided_slice %73 {offsets = [0, 16], sizes = [16, 16], strides = [1, 1]} : vector<16x64xf32> to vector<16x16xf32>
    %92 = vector.extract_strided_slice %74 {offsets = [0, 16], sizes = [16, 16], strides = [1, 1]} : vector<16x64xf32> to vector<16x16xf32>
    %cst_32 = arith.constant dense<0.000000e+00> : vector<16x16xf32>
    %93 = tpu.matmul %90, %91, %cst_32 {dimension_numbers = #tpu.dot_dimension_numbers<[1], [1], [0], [0], [0, 0, 1, 0], [], []>} : vector<16x16xf32>, vector<16x16xf32>, vector<16x16xf32> -> vector<16x16xf32>
    %cst_33 = arith.constant dense<0xFF800000> : vector<16xf32>
    %94 = vector.multi_reduction <maximumf>, %93, %cst_33 [1] : vector<16x16xf32> to vector<16xf32>
    %95 = vector.shape_cast %94 : vector<16xf32> to vector<16x1xf32>
    %96 = vector.broadcast %95 : vector<16x1xf32> to vector<16x16xf32>
    %97 = arith.subf %93, %96 : vector<16x16xf32>
    %98 = math.exp %97 : vector<16x16xf32>
    %cst_34 = arith.constant dense<0.000000e+00> : vector<16xf32>
    %99 = vector.multi_reduction <add>, %98, %cst_34 [1] : vector<16x16xf32> to vector<16xf32>
    %100 = vector.shape_cast %99 : vector<16xf32> to vector<16x1xf32>
    %101 = vector.broadcast %100 : vector<16x1xf32> to vector<16x16xf32>
    %102 = arith.divf %98, %101 : vector<16x16xf32>
    %cst_35 = arith.constant dense<0.000000e+00> : vector<16x16xf32>
    %103 = tpu.matmul %102, %92, %cst_35 {dimension_numbers = #tpu.dot_dimension_numbers<[1], [0], [0], [1], [0, 0, 1, 1], [], []>} : vector<16x16xf32>, vector<16x16xf32>, vector<16x16xf32> -> vector<16x16xf32>
    %c16_36 = arith.constant 16 : index
    %c16_37 = arith.constant 16 : index
    %104 = vector.load %arg4[%c16_36, %c16_37] : memref<32x64xf32, #tpu.memory_space<vmem>>, vector<16x16xf32>
    tpu.vector_store %arg4[%c16_36, %c16_37], %103 {strides = array<i32>} : memref<32x64xf32, #tpu.memory_space<vmem>>, vector<16x16xf32>,
    %105 = vector.extract_strided_slice %72 {offsets = [0, 32], sizes = [16, 16], strides = [1, 1]} : vector<16x64xf32> to vector<16x16xf32>
    %106 = vector.extract_strided_slice %73 {offsets = [0, 32], sizes = [16, 16], strides = [1, 1]} : vector<16x64xf32> to vector<16x16xf32>
    %107 = vector.extract_strided_slice %74 {offsets = [0, 32], sizes = [16, 16], strides = [1, 1]} : vector<16x64xf32> to vector<16x16xf32>
    %cst_38 = arith.constant dense<0.000000e+00> : vector<16x16xf32>
    %108 = tpu.matmul %105, %106, %cst_38 {dimension_numbers = #tpu.dot_dimension_numbers<[1], [1], [0], [0], [0, 0, 1, 0], [], []>} : vector<16x16xf32>, vector<16x16xf32>, vector<16x16xf32> -> vector<16x16xf32>
    %cst_39 = arith.constant dense<0xFF800000> : vector<16xf32>
    %109 = vector.multi_reduction <maximumf>, %108, %cst_39 [1] : vector<16x16xf32> to vector<16xf32>
    %110 = vector.shape_cast %109 : vector<16xf32> to vector<16x1xf32>
    %111 = vector.broadcast %110 : vector<16x1xf32> to vector<16x16xf32>
    %112 = arith.subf %108, %111 : vector<16x16xf32>
    %113 = math.exp %112 : vector<16x16xf32>
    %cst_40 = arith.constant dense<0.000000e+00> : vector<16xf32>
    %114 = vector.multi_reduction <add>, %113, %cst_40 [1] : vector<16x16xf32> to vector<16xf32>
    %115 = vector.shape_cast %114 : vector<16xf32> to vector<16x1xf32>
    %116 = vector.broadcast %115 : vector<16x1xf32> to vector<16x16xf32>
    %117 = arith.divf %113, %116 : vector<16x16xf32>
    %cst_41 = arith.constant dense<0.000000e+00> : vector<16x16xf32>
    %118 = tpu.matmul %117, %107, %cst_41 {dimension_numbers = #tpu.dot_dimension_numbers<[1], [0], [0], [1], [0, 0, 1, 1], [], []>} : vector<16x16xf32>, vector<16x16xf32>, vector<16x16xf32> -> vector<16x16xf32>
    %c16_42 = arith.constant 16 : index
    %c32_43 = arith.constant 32 : index
    %119 = vector.load %arg4[%c16_42, %c32_43] : memref<32x64xf32, #tpu.memory_space<vmem>>, vector<16x16xf32>
    tpu.vector_store %arg4[%c16_42, %c32_43], %118 {strides = array<i32>} : memref<32x64xf32, #tpu.memory_space<vmem>>, vector<16x16xf32>,
    %120 = vector.extract_strided_slice %72 {offsets = [0, 48], sizes = [16, 16], strides = [1, 1]} : vector<16x64xf32> to vector<16x16xf32>
    %121 = vector.extract_strided_slice %73 {offsets = [0, 48], sizes = [16, 16], strides = [1, 1]} : vector<16x64xf32> to vector<16x16xf32>
    %122 = vector.extract_strided_slice %74 {offsets = [0, 48], sizes = [16, 16], strides = [1, 1]} : vector<16x64xf32> to vector<16x16xf32>
    %cst_44 = arith.constant dense<0.000000e+00> : vector<16x16xf32>
    %123 = tpu.matmul %120, %121, %cst_44 {dimension_numbers = #tpu.dot_dimension_numbers<[1], [1], [0], [0], [0, 0, 1, 0], [], []>} : vector<16x16xf32>, vector<16x16xf32>, vector<16x16xf32> -> vector<16x16xf32>
    %cst_45 = arith.constant dense<0xFF800000> : vector<16xf32>
    %124 = vector.multi_reduction <maximumf>, %123, %cst_45 [1] : vector<16x16xf32> to vector<16xf32>
    %125 = vector.shape_cast %124 : vector<16xf32> to vector<16x1xf32>
    %126 = vector.broadcast %125 : vector<16x1xf32> to vector<16x16xf32>
    %127 = arith.subf %123, %126 : vector<16x16xf32>
    %128 = math.exp %127 : vector<16x16xf32>
    %cst_46 = arith.constant dense<0.000000e+00> : vector<16xf32>
    %129 = vector.multi_reduction <add>, %128, %cst_46 [1] : vector<16x16xf32> to vector<16xf32>
    %130 = vector.shape_cast %129 : vector<16xf32> to vector<16x1xf32>
    %131 = vector.broadcast %130 : vector<16x1xf32> to vector<16x16xf32>
    %132 = arith.divf %128, %131 : vector<16x16xf32>
    %cst_47 = arith.constant dense<0.000000e+00> : vector<16x16xf32>
    %133 = tpu.matmul %132, %122, %cst_47 {dimension_numbers = #tpu.dot_dimension_numbers<[1], [0], [0], [1], [0, 0, 1, 1], [], []>} : vector<16x16xf32>, vector<16x16xf32>, vector<16x16xf32> -> vector<16x16xf32>
    %c16_48 = arith.constant 16 : index
    %c48_49 = arith.constant 48 : index
    %134 = vector.load %arg4[%c16_48, %c48_49] : memref<32x64xf32, #tpu.memory_space<vmem>>, vector<16x16xf32>
    tpu.vector_store %arg4[%c16_48, %c48_49], %133 {strides = array<i32>} : memref<32x64xf32, #tpu.memory_space<vmem>>, vector<16x16xf32>,
    return
  }
  func.func @transform_0(%arg0: i32) -> (i32, i32) {
    %c0_i32 = arith.constant 0 : i32
    %c0_i32_0 = arith.constant 0 : i32
    %c0_i32_1 = arith.constant 0 : i32
    return %c0_i32, %c0_i32_0 : i32, i32
  }
  func.func @transform_1(%arg0: i32) -> (i32, i32) {
    %c0_i32 = arith.constant 0 : i32
    %c0_i32_0 = arith.constant 0 : i32
    %c0_i32_1 = arith.constant 0 : i32
    return %c0_i32, %c0_i32_0 : i32, i32
  }
  func.func @transform_2(%arg0: i32) -> (i32, i32) {
    %c0_i32 = arith.constant 0 : i32
    %c0_i32_0 = arith.constant 0 : i32
    %c0_i32_1 = arith.constant 0 : i32
    return %c0_i32, %c0_i32_0 : i32, i32
  }
  func.func @transform_3(%arg0: i32) -> (i32, i32) {
    %c0_i32 = arith.constant 0 : i32
    %c0_i32_0 = arith.constant 0 : i32
    %c0_i32_1 = arith.constant 0 : i32
    return %c0_i32, %c0_i32_0 : i32, i32
  }
}

</mosaic_0001>

<bundles_post_ra>
// kernel: multi_head_self_attention.1
= control target key start
LH: loop header
LB: loop body
LE: loop exit
PB: predicated region body
PF: predicated region fallthrough
CT: control target
= control target key end

     0   :  { %8 = vsyncpa [#allocation3], 0  ;;  %s1911_s0 = inlined_call_operand.hbm [shape: f32[32,32], index: 0, kind: input, shape index: {}]   ;;  %s1912_s1 = inlined_call_operand.hbm [shape: f32[32,192], index: 1, kind: input, shape index: {}]   ;;  %s1913_s2 = inlined_call_operand.vmem [shape: f32[1,192], index: 2, kind: input, shape index: {}]   ;;  %s1914_s3 = inlined_call_operand.hbm [shape: f32[32,64], index: 3, kind: output, shape index: {}]  }
   0x1   :  { %9 = vsyncpa [#allocation6], 0 }
   0x2   :  { %10 = vsyncpa [#allocation4], 0  ;;  %s15_s14 = sshll.u32 %s1911_s0, 4  ;;  %s1429_s15 = smov [#allocation2]   ;;  %s16_s14 = int_to_ptr.hbm [resolvable:$true] %s15_s14 }
   0x3   :  { %s17_s16 = sshll.u32 %s1429_s15, 4  ;;  %s28_s19 = sshll.u32 %s1912_s1, 4  ;;  %s18_s16 = int_to_ptr.vmem [resolvable:$true] %s17_s16  ;;  %s29_s19 = int_to_ptr.hbm [resolvable:$true] %s28_s19 }
   0x4   :  { %s1430_s20 = smov 128   ;;  %s1431_s21 = smov 8  }
   0x5   :  { %23 = dma.hbm_to_vmem [thread:$0]  %s16_s14, 512, %s18_s16, [#allocation3], %s1430_s20, %s1430_s20, %s1431_s21  }
   0x6   :  { %s1432_s22 = smov [#allocation5]   ;;  %s1433_s24 = smov 256  }
   0x7   :  { %s30_s23 = sshll.u32 %s1432_s22, 4  ;;  %s1434_s0 = smov 16   ;;  %s31_s23 = int_to_ptr.vmem [resolvable:$true] %s30_s23 }
   0x8   :  { %36 = dma.hbm_to_vmem [thread:$0]  %s29_s19, 1024, %s31_s23, [#allocation6], %s1433_s24, %s1433_s24, %s1434_s0  }
   0x9   :  { %1423 = dma.done.wait [#allocation3], 512  }
   0xa   :  { %1424 = vsyncadd [#allocation3], 4294966784 }
   0xb   :  { %1425 = dma.done.wait [#allocation6], 1024  }
   0xc   :  { %1426 = vsyncadd [#allocation6], 4294966272  ;;  %v57_v0 = vld [vmem:[#allocation5 + $0x30] sm:$0xff]  ;;  %v55_v1 = vld [vmem:[#allocation5 + $0x20] sm:$0xff]  ;;  %vm65_vm0 = vcmask 261120   ;;  %s1435_s26 = smov 112  }
   0xd   :  { %90 = vmatpush.msra.mxu0 %v57_v0  ;;  %v53_v2 = vld [vmem:[#allocation5 + $0x10] sm:$0xff]  ;;  %v58_v3 = vld [vmem:[#allocation5 + $0x38] sm:$0xff]  ;;  %v56_v4 = vld [vmem:[#allocation5 + $0x28] sm:$0xff]  ;;  %s1436_s27 = smov 64   ;;  %s1437_s28 = smov 48   ;;  %vm142_vm1 = vcmask 130048  }
   0xe   :  { %119 = vmatpush.msra.mxu1 %v58_v3  ;;  %v51_v5 = vld [vmem:[#allocation5] sm:$0xff]  ;;  %v48_v7 = vld [vmem:[#allocation2 + $0x8] sm:$0xff]  ;;  %v54_v8 = vld [vmem:[#allocation5 + $0x18] sm:$0xff]  ;;  %s1439_s29 = smov 96   ;;  %s1440_s30 = smov 80  }
   0xf   :  { %91 = vmatpush.msra.mxu0 %v55_v1  ;;  %v47_v6 = vld [vmem:[#allocation2] sm:$0xff]  ;;  %v52_v9 = vld [vmem:[#allocation5 + $0x8] sm:$0xff]  ;;  %v49_v25 = vld [vmem:[#allocation2 + $0x10] sm:$0xff]  ;;  %s1441_s4 = smov [#allocation7]   ;;  %s1174_s8 = sshll.u32 %s1914_s3, 4  ;;  %s1175_s8 = int_to_ptr.hbm [resolvable:$true] %s1174_s8 }
  0x10   :  { %120 = vmatpush.msra.mxu1 %v56_v4  ;;  %v59_v10 = vld [vmem:[%s1913_s2] sm:$0x3]  ;;  %s1438_s2 = smov 32   ;;  %v50_v28 = vld [vmem:[#allocation2 + $0x18] sm:$0xff]  ;;  %s1172_s5 = sshll.u32 %s1441_s4, 4  ;;  %s1173_s5 = int_to_ptr.vmem [resolvable:$true] %s1172_s5 }
  0x11   :  { %92 = vmatpush.msra.mxu0 %v53_v2  ;;  %v61_v11 = vperm.slane %v59_v10, 0  ;;  %v1493_v17 = vperm.slane %v59_v10, 1 }
  0x12   :  { %121 = vmatpush.msra.mxu1 %v54_v8 }
  0x13   :  { %93 = vmatpush.msra.mxu0 %v51_v5 }
  0x14   :  { %1188 = vmatmul.msk.f32.vlgmr.msra.gmra.mxu0 %vm65_vm0, %v47_v6  ;;  %122 = vmatpush.msra.mxu1 %v52_v9 }
  0x15   :  { %1192 = vmatmul.msk.f32.vlgmr.msra.gmra.mxu1 %vm65_vm0, %v47_v6 }
  0x1c   :  { %1189 = vmatmul.msk.f32.gmra.mxu0 %vm65_vm0, %v48_v7 }
  0x1d   :  { %1193 = vmatmul.msk.f32.gmra.mxu1 %vm65_vm0, %v48_v7 }
  0x24   :  { %1190 = vmatmul.msk.f32.gmra.mxu0 %vm65_vm0, %v49_v25 }
  0x25   :  { %1194 = vmatmul.msk.f32.gmra.mxu1 %vm65_vm0, %v49_v25 }
  0x2c   :  { %1191 = vmatmul.msk.f32.gmra.mxu0 %vm65_vm0, %v50_v28 }
  0x2d   :  { %1195 = vmatmul.msk.f32.gmra.mxu1 %vm65_vm0, %v50_v28 }
  0x91   :  { %v95_v12 = vpop.f32.mrf.mxu0 }
  0x92   :  { %v1479_v13 = vadd.f32 %v95_v12, %v61_v11  ;;  %v124_v16 = vpop.f32.mrf.mxu1 }
  0x93   :  { %v1496_v19 = vadd.f32 %v124_v16, %v1493_v17 }
  0x94   :  { %253 = vrot.lane.b32.xlu2 %v1479_v13, %s1435_s26 }
  0x99   :  { %v98_v14 = vpop.f32.mrf.mxu0 }
  0x9a   :  { %v99_v15 = vadd.f32 %v98_v14, %v61_v11  ;;  %v127_v18 = vpop.f32.mrf.mxu1 }
  0x9b   :  { %v1499_v20 = vadd.f32 %v127_v18, %v1493_v17 }
  0x9c   :  { %140 = vrot.lane.b32.xlu0 %v99_v15, %s1436_s27 }
  0x9d   :  { %242 = vmatpush.msra.mxu3 %v1499_v20 }
  0x9f   :  { %243 = vmatpush.msra.mxu3 %v1496_v19 }
  0xa1   :  { %v101_v33 = vpop.f32.mrf.mxu0 }
  0xa2   :  { %v1525_v34 = vadd.f32 %v101_v33, %v61_v11 }
  0xa4   :  { %138 = vrot.lane.b32.xlu0 %v1479_v13, %s1436_s27 }
  0xa9   :  { %v104_v35 = vpop.f32.mrf.mxu0 }
  0xaa   :  { %v1529_v36 = vadd.f32 %v104_v35, %v61_v11 }
  0xac   :  { %259 = vrot.lane.b32.xlu0 %v99_v15, %s1437_s28 }
  0xb4   :  { %255 = vrot.lane.b32.xlu0 %v99_v15, %s1435_s26 }
  0xbc   :  { %394 = vrot.lane.b32.xlu0 %v99_v15, %s1438_s2 }
  0xc4   :  { %527 = vrot.lane.b32.xlu0 %v99_v15, %s1434_s0 }
  0xcc   :  { %388 = vrot.lane.b32.xlu0 %v1479_v13, %s1439_s29 }
  0xd4   :  { %523 = vrot.lane.b32.xlu0 %v99_v15, %s1440_s30 }
  0xdc   :  { %656 = vrot.lane.b32.xlu0 %v1525_v34, %s1436_s27 }
  0xe4   :  { %772 = vrot.lane.b32.xlu0 %v1529_v36, %s1435_s26 }
  0xec   :  { %908 = vrot.lane.b32.xlu0 %v1525_v34, %s1438_s2 }
  0xee   :  { %v254_v51 = vpop.permute.xlu2 %253 }
  0xf4   :  { %1036 = vrot.lane.b32.xlu0 %v1525_v34, %s1440_s30 }
 0x10e   :  { %v141_v21 = vpop.permute.xlu0 %140 }
 0x10f   :  { %1196 = vmatpush.xpose.msk.msra.mxu2 %vm142_vm1, %v141_v21 }
 0x116   :  { %v139_v22 = vpop.permute.xlu0 %138 }
 0x117   :  { %1197 = vmatpush.xpose.msk.msra.mxu2 %vm142_vm1, %v139_v22 }
 0x11a   :  { %1198 = vmatmul.msk.f32.vlgmr.msra.gmra.mxu2 %vm142_vm1, %v1479_v13 }
 0x11e   :  { %v260_v23 = vpop.permute.xlu0 %259 }
 0x11f   :  { %1202 = vmatpush.xpose.msk.msrb.mxu3 %vm142_vm1, %v260_v23 }
 0x122   :  { %1199 = vmatmul.msk.f32.gmra.mxu2 %vm142_vm1, %v99_v15 }
 0x126   :  { %v1509_v24 = vpop.permute.xlu0 %255 }
 0x12e   :  { %v1513_v26 = vpop.permute.xlu0 %394 }
 0x136   :  { %v528_v27 = vpop.permute.xlu0 %527 }
 0x137   :  { %1214 = vmatpush.xpose.msk.msrb.mxu1 %vm142_vm1, %v528_v27 }
 0x13e   :  { %v389_v57 = vpop.permute.xlu0 %388 }
 0x146   :  { %v524_v9 = vpop.permute.xlu0 %523 }
 0x14e   :  { %v657_v16 = vpop.permute.xlu0 %656 }
 0x156   :  { %v773_v22 = vpop.permute.xlu0 %772 }
 0x15e   :  { %v909_v27 = vpop.permute.xlu0 %908 }
 0x19d   :  { %v168_v29 = vpop.f32.mrf.mxu2 }
 0x19e   :  { %v174_v30 = vsel %vm142_vm1, %v168_v29, -inf }
 0x19f   :  { %175 = vmax.xlane.f32.xlu1 %v174_v30  ;;  %v1037_v30 = vpop.permute.xlu0 %1036 }
 0x1a5   :  { %v171_v31 = vpop.f32.mrf.mxu2 }
 0x1a6   :  { %v177_v32 = vsel %vm142_vm1, %v171_v31, -inf }
 0x1a7   :  { %178 = vmax.xlane.f32.xlu1 %v177_v32  ;;  %v1598_v32 = vpop.f32.mrf.mxu1 }
 0x1af   :  { %v1600_v33 = vpop.f32.mrf.mxu1 }
 0x1c0   :  { %257 = vrot.lane.b32.xlu1 %v1479_v13, %s1437_s28 }
 0x1c8   :  { %525 = vrot.lane.b32.xlu1 %v1479_v13, %s1434_s0 }
 0x1d0   :  { %390 = vrot.lane.b32.xlu1 %v99_v15, %s1439_s29 }
 0x1d8   :  { %776 = vrot.lane.b32.xlu1 %v1529_v36, %s1437_s28 }
 0x1e0   :  { %770 = vrot.lane.b32.xlu1 %v1525_v34, %s1435_s26 }
 0x1e8   :  { %1042 = vrot.lane.b32.xlu1 %v1529_v36, %s1434_s0 }
 0x1f0   :  { %904 = vrot.lane.b32.xlu1 %v1525_v34, %s1439_s29 }
 0x1f8   :  { %1038 = vrot.lane.b32.xlu1 %v1529_v36, %s1440_s30 }
 0x212   :  { %v176_v37 = vpop.xlane.xlu1 %175 }
 0x213   :  { %v180_v38 = vsub.f32 %v168_v29, %v176_v37 }
 0x215   :  { %v182_v39 = vmul.f32 1.442695, %v180_v38 }
 0x217   :  { %1287 = vpow2.f32 %v182_v39 }
 0x21a   :  { %v179_v40 = vpop.xlane.xlu1 %178 }
 0x21b   :  { %v181_v41 = vsub.f32 %v171_v31, %v179_v40 }
 0x21d   :  { %v1288_v42 = vpop.eup %1287  ;;  %v184_v43 = vmul.f32 1.442695, %v181_v41 }
 0x21e   :  { %v186_v44 = vsel %vm142_vm1, %v1288_v42, 0.0 }
 0x21f   :  { %1289 = vpow2.f32 %v184_v43  ;;  %187 = vadd.xlane.f32.xlu2 %v186_v44 }
 0x225   :  { %v1290_v45 = vpop.eup %1289 }
 0x226   :  { %v189_v46 = vsel %vm142_vm1, %v1290_v45, 0.0 }
 0x227   :  { %190 = vadd.xlane.f32.xlu2 %v189_v46 }
 0x232   :  { %v258_v47 = vpop.permute.xlu1 %257 }
 0x233   :  { %1203 = vmatpush.xpose.msk.msrb.mxu3 %vm142_vm1, %v258_v47  ;;  %v1611_v47 = vpack.i.bf16 %v1496_v19, %v1499_v20 }
 0x23a   :  { %v526_v48 = vpop.permute.xlu1 %525 }
 0x23b   :  { %1215 = vmatpush.xpose.msk.msrb.mxu1 %vm142_vm1, %v526_v48 }
 0x23f   :  { %392 = vrot.lane.b32.xlu2 %v1479_v13, %s1438_s2 }
 0x242   :  { %v1563_v49 = vpop.permute.xlu1 %390 }
 0x247   :  { %521 = vrot.lane.b32.xlu2 %v1479_v13, %s1440_s30 }
 0x24a   :  { %v777_v50 = vpop.permute.xlu1 %776 }
 0x24b   :  { %1226 = vmatpush.xpose.msk.msra.mxu1 %vm142_vm1, %v777_v50 }
 0x24f   :  { %658 = vrot.lane.b32.xlu2 %v1529_v36, %s1436_s27 }
 0x252   :  { %v771_v18 = vpop.permute.xlu1 %770 }
 0x257   :  { %774 = vrot.lane.b32.xlu2 %v1525_v34, %s1437_s28 }
 0x25a   :  { %v1043_v25 = vpop.permute.xlu1 %1042 }
 0x25f   :  { %910 = vrot.lane.b32.xlu2 %v1529_v36, %s1438_s2 }
 0x262   :  { %v905_v29 = vpop.permute.xlu1 %904 }
 0x267   :  { %1040 = vrot.lane.b32.xlu2 %v1525_v34, %s1434_s0 }
 0x26f   :  { %906 = vrot.lane.b32.xlu2 %v1529_v36, %s1439_s29 }
 0x292   :  { %v188_v52 = vpop.xlane.xlu2 %187 }
 0x293   :  { %1291 = vrcp.f32 %v188_v52  ;;  %v203_v58 = vand.u32 2147483648, %v188_v52  ;;  %v201_v60 = vand.u32 2147483647, %v188_v52  ;;  %vm197_vm3 = vweird.f32 %v188_v52 }
 0x295   :  { %v204_v63 = vor.u32 1.1754944e-38, %v203_v58  ;;  %vm202_vm5 = vcmp.eq.f32.partialorder %v201_v60, 8.507059e+37 }
 0x299   :  { %v1292_v53 = vpop.eup %1291 }
 0x29a   :  { %v193_v54 = vmul.f32 %v1292_v53, %v188_v52  ;;  %v191_v55 = vpop.xlane.xlu2 %190  ;;  %vm198_vm2 = vweird.f32 %v1292_v53 }
 0x29b   :  { %1293 = vrcp.f32 %v191_v55  ;;  %vm199_vm4 = vmor %vm197_vm3, %vm198_vm2  ;;  %v218_v6 = vand.u32 2147483648, %v191_v55  ;;  %v216_v8 = vand.u32 2147483647, %v191_v55  ;;  %vm212_vm7 = vweird.f32 %v191_v55 }
 0x29c   :  { %v194_v56 = vsub.f32 1.0, %v193_v54 }
 0x29d   :  { %v219_v11 = vor.u32 1.1754944e-38, %v218_v6  ;;  %vm217_vm9 = vcmp.eq.f32.partialorder %v216_v8, 8.507059e+37 }
 0x29e   :  { %v195_v59 = vmul.f32 %v1292_v53, %v194_v56 }
 0x2a0   :  { %v196_v61 = vadd.f32 %v1292_v53, %v195_v59 }
 0x2a1   :  { %v1294_v62 = vpop.eup %1293 }
 0x2a2   :  { %v208_v0 = vmul.f32 %v1294_v62, %v191_v55  ;;  %v393_v1 = vpop.permute.xlu2 %392  ;;  %v200_v2 = vsel %vm199_vm4, %v1292_v53, %v196_v61  ;;  %vm213_vm6 = vweird.f32 %v1294_v62 }
 0x2a3   :  { %v205_v3 = vsel %vm202_vm5, %v204_v63, %v200_v2  ;;  %vm214_vm8 = vmor %vm212_vm7, %vm213_vm6 }
 0x2a4   :  { %v209_v4 = vsub.f32 1.0, %v208_v0  ;;  %v206_v5 = vmul.f32 %v1288_v42, %v205_v3 }
 0x2a6   :  { %v210_v7 = vmul.f32 %v1294_v62, %v209_v4  ;;  %1200 = vmatmul.msk.f32.vlgmr.msra.gmra.mxu3 %vm142_vm1, %v206_v5 }
 0x2a7   :  { %1208 = vmatpush.xpose.msk.msra.mxu3 %vm142_vm1, %v1513_v26 }
 0x2a8   :  { %v211_v10 = vadd.f32 %v1294_v62, %v210_v7 }
 0x2aa   :  { %v522_v12 = vpop.permute.xlu2 %521  ;;  %v215_v13 = vsel %vm214_vm8, %v1294_v62, %v211_v10 }
 0x2ab   :  { %1209 = vmatpush.xpose.msk.msra.mxu3 %vm142_vm1, %v393_v1  ;;  %1216 = vmatmul.msk.f32.vlgmr.msrb.gmra.mxu1 %vm142_vm1, %v522_v12  ;;  %v220_v14 = vsel %vm217_vm9, %v219_v11, %v215_v13 }
 0x2ac   :  { %v221_v15 = vmul.f32 %v1290_v45, %v220_v14 }
 0x2ae   :  { %1201 = vmatmul.msk.f32.gmra.mxu3 %vm142_vm1, %v221_v15 }
 0x2b2   :  { %v659_v21 = vpop.permute.xlu2 %658 }
 0x2b3   :  { %1217 = vmatmul.msk.f32.gmra.mxu1 %vm142_vm1, %v524_v9 }
 0x2b6   :  { %1204 = vmatmul.msk.f32.vlgmr.msrb.gmra.mxu3 %vm142_vm1, %v254_v51 }
 0x2b7   :  { %1220 = vmatpush.xpose.msk.msrb.mxu3 %vm142_vm1, %v659_v21 }
 0x2ba   :  { %v775_v23 = vpop.permute.xlu2 %774 }
 0x2bb   :  { %1221 = vmatpush.xpose.msk.msrb.mxu3 %vm142_vm1, %v657_v16  ;;  %1227 = vmatpush.xpose.msk.msra.mxu1 %vm142_vm1, %v775_v23 }
 0x2be   :  { %1205 = vmatmul.msk.f32.gmra.mxu3 %vm142_vm1, %v1509_v24  ;;  %1228 = vmatmul.msk.f32.vlgmr.msra.gmra.mxu1 %vm142_vm1, %v771_v18  ;;  %v1039_v24 = vpop.permute.xlu1 %1038 }
 0x2bf   :  { %1238 = vmatpush.xpose.msk.msrb.mxu1 %vm142_vm1, %v1043_v25 }
 0x2c2   :  { %v911_v26 = vpop.permute.xlu2 %910 }
 0x2c6   :  { %1210 = vmatmul.msk.f32.vlgmr.msra.gmra.mxu3 %vm142_vm1, %v389_v57  ;;  %1229 = vmatmul.msk.f32.gmra.mxu1 %vm142_vm1, %v773_v22 }
 0x2c7   :  { %1232 = vmatpush.xpose.msk.msra.mxu3 %vm142_vm1, %v911_v26 }
 0x2ca   :  { %v1041_v28 = vpop.permute.xlu2 %1040 }
 0x2cb   :  { %1233 = vmatpush.xpose.msk.msra.mxu3 %vm142_vm1, %v909_v27  ;;  %1239 = vmatpush.xpose.msk.msrb.mxu1 %vm142_vm1, %v1041_v28 }
 0x2ce   :  { %1211 = vmatmul.msk.f32.gmra.mxu3 %vm142_vm1, %v1563_v49  ;;  %1240 = vmatmul.msk.f32.vlgmr.msrb.gmra.mxu1 %vm142_vm1, %v1037_v30 }
 0x2d2   :  { %v907_v31 = vpop.permute.xlu2 %906 }
 0x2d6   :  { %1222 = vmatmul.msk.f32.vlgmr.msrb.gmra.mxu3 %vm142_vm1, %v1525_v34  ;;  %1241 = vmatmul.msk.f32.gmra.mxu1 %vm142_vm1, %v1039_v24 }
 0x2de   :  { %1223 = vmatmul.msk.f32.gmra.mxu3 %vm142_vm1, %v1529_v36 }
 0x2e6   :  { %1234 = vmatmul.msk.f32.vlgmr.msra.gmra.mxu3 %vm142_vm1, %v905_v29 }
 0x2ee   :  { %1235 = vmatmul.msk.f32.gmra.mxu3 %vm142_vm1, %v907_v31 }
 0x328   :  { %v554_v35 = vpop.f32.mrf.mxu1 }
 0x329   :  { %v245_v37 = vpop.f32.mrf.mxu3  ;;  %v560_v38 = vsel %vm142_vm1, %v554_v35, -inf }
 0x32a   :  { %251 = vst.msk [vmem:[#allocation7] sm:$0xff] %vm142_vm1, %v245_v37  ;;  %561 = vmax.xlane.f32.xlu1 %v560_v38 }
 0x330   :  { %v557_v34 = vpop.f32.mrf.mxu1 }
 0x331   :  { %v248_v39 = vpop.f32.mrf.mxu3  ;;  %v563_v36 = vsel %vm142_vm1, %v557_v34, -inf }
 0x332   :  { %252 = vst.msk [vmem:[#allocation7 + $0x8] sm:$0xff] %vm142_vm1, %v248_v39  ;;  %564 = vmax.xlane.f32.xlu0 %v563_v36 }
 0x339   :  { %v286_v46 = vpop.f32.mrf.mxu3 }
 0x33a   :  { %v292_v48 = vsel %vm142_vm1, %v286_v46, -inf }
 0x33b   :  { %v803_v40 = vpop.f32.mrf.mxu1 }
 0x33c   :  { %v809_v41 = vsel %vm142_vm1, %v803_v40, -inf }
 0x33d   :  { %810 = vmax.xlane.f32.xlu2 %v809_v41 }
 0x341   :  { %v1620_v51 = vpop.f32.mrf.mxu3 }
 0x342   :  { %v295_v53 = vsel %vm142_vm1, %v1620_v51, -inf }
 0x343   :  { %v806_v42 = vpop.f32.mrf.mxu1 }
 0x344   :  { %v812_v43 = vsel %vm142_vm1, %v806_v42, -inf }
 0x345   :  { %813 = vmax.xlane.f32.xlu1 %v812_v43 }
 0x349   :  { %v1624_v52 = vpop.f32.mrf.mxu3 }
 0x34a   :  { %v427_v54 = vsel %vm142_vm1, %v1624_v52, -inf }
 0x34b   :  { %v1069_v44 = vpop.f32.mrf.mxu1 }
 0x34c   :  { %v1075_v45 = vsel %vm142_vm1, %v1069_v44, -inf }
 0x34d   :  { %1076 = vmax.xlane.f32.xlu0 %v1075_v45 }
 0x351   :  { %v1626_v19 = vpop.f32.mrf.mxu3 }
 0x352   :  { %v430_v56 = vsel %vm142_vm1, %v1626_v19, -inf }
 0x353   :  { %v1616_v49 = vpop.f32.mrf.mxu1 }
 0x354   :  { %v1078_v50 = vsel %vm142_vm1, %v1616_v49, -inf }
 0x355   :  { %1263 = vrot.lane.b32.xlu2 %v1611_v47, %s1440_s30  ;;  %293 = vmax.xlane.f32.xlu0 %v292_v48 }
 0x359   :  { %v1628_v20 = vpop.f32.mrf.mxu3 }
 0x35a   :  { %v691_v21 = vsel %vm142_vm1, %v1628_v20, -inf }
 0x35d   :  { %1079 = vmax.xlane.f32.xlu0 %v1078_v50 }
 0x35e   :  { %1258 = vrot.lane.b32.xlu1 %v1611_v47, %s1435_s26 }
 0x361   :  { %v1634_v55 = vpop.f32.mrf.mxu3 }
 0x362   :  { %v694_v57 = vsel %vm142_vm1, %v1634_v55, -inf }
 0x369   :  { %v1640_v58 = vpop.f32.mrf.mxu3 }
 0x36a   :  { %v943_v59 = vsel %vm142_vm1, %v1640_v58, -inf }
 0x371   :  { %v1644_v60 = vpop.f32.mrf.mxu3 }
 0x372   :  { %v946_v62 = vsel %vm142_vm1, %v1644_v60, -inf }
 0x37e   :  { %296 = vmax.xlane.f32.xlu2 %v295_v53 }
 0x386   :  { %428 = vmax.xlane.f32.xlu2 %v427_v54 }
 0x388   :  { %431 = vmax.xlane.f32.xlu1 %v430_v56 }
 0x38e   :  { %695 = vmax.xlane.f32.xlu2 %v694_v57 }
 0x396   :  { %944 = vmax.xlane.f32.xlu2 %v943_v59 }
 0x39d   :  { %v562_v61 = vpop.xlane.xlu1 %561 }
 0x39e   :  { %v566_v63 = vsub.f32 %v554_v35, %v562_v61  ;;  %947 = vmax.xlane.f32.xlu2 %v946_v62  ;;  %v1695_v61 = vadd.f32 %v1598_v32, %v1493_v17  ;;  %v1699_v62 = vadd.f32 %v1600_v33, %v1493_v17 }
 0x3a0   :  { %v568_v0 = vmul.f32 1.442695, %v566_v63  ;;  %v1272_v63 = vpack.i.bf16 %v1695_v61, %v1699_v62 }
 0x3a2   :  { %1295 = vpow2.f32 %v568_v0 }
 0x3a5   :  { %v565_v1 = vpop.xlane.xlu0 %564 }
 0x3a6   :  { %v567_v2 = vsub.f32 %v557_v34, %v565_v1 }
 0x3a8   :  { %v1648_v3 = vpop.eup %1295  ;;  %v570_v4 = vmul.f32 1.442695, %v567_v2 }
 0x3a9   :  { %v572_v5 = vsel %vm142_vm1, %v1648_v3, 0.0 }
 0x3aa   :  { %1297 = vpow2.f32 %v570_v4  ;;  %573 = vadd.xlane.f32.xlu0 %v572_v5 }
 0x3b0   :  { %v1652_v6 = vpop.eup %1297  ;;  %v811_v7 = vpop.xlane.xlu2 %810 }
 0x3b1   :  { %v815_v8 = vsub.f32 %v803_v40, %v811_v7  ;;  %v575_v9 = vsel %vm142_vm1, %v1652_v6, 0.0 }
 0x3b2   :  { %576 = vadd.xlane.f32.xlu0 %v575_v9 }
 0x3b3   :  { %v817_v10 = vmul.f32 1.442695, %v815_v8 }
 0x3b5   :  { %1299 = vpow2.f32 %v817_v10 }
 0x3b8   :  { %v814_v11 = vpop.xlane.xlu1 %813  ;;  %v1264_v24 = vpop.permute.xlu2 %1263 }
 0x3b9   :  { %v816_v13 = vsub.f32 %v806_v42, %v814_v11  ;;  %v1265_v38 = vunpack.i.l.bf16 %v1264_v24  ;;  %v1266_v36 = vunpack.i.h.bf16 %v1264_v24 }
 0x3bb   :  { %v1656_v12 = vpop.eup %1299  ;;  %v819_v15 = vmul.f32 1.442695, %v816_v13 }
 0x3bc   :  { %v821_v14 = vsel %vm142_vm1, %v1656_v12, 0.0 }
 0x3bd   :  { %822 = vadd.xlane.f32.xlu0 %v821_v14  ;;  %1301 = vpow2.f32 %v819_v15 }
 0x3c0   :  { %v1077_v16 = vpop.xlane.xlu0 %1076 }
 0x3c1   :  { %v1081_v18 = vsub.f32 %v1069_v44, %v1077_v16 }
 0x3c3   :  { %v1083_v22 = vmul.f32 1.442695, %v1081_v18  ;;  %v1662_v25 = vpop.eup %1301 }
 0x3c4   :  { %v824_v28 = vsel %vm142_vm1, %v1662_v25, 0.0 }
 0x3c5   :  { %692 = vmax.xlane.f32.xlu0 %v691_v21  ;;  %1303 = vpow2.f32 %v1083_v22 }
 0x3c8   :  { %v294_v23 = vpop.xlane.xlu0 %293 }
 0x3c9   :  { %v298_v26 = vsub.f32 %v286_v46, %v294_v23 }
 0x3cb   :  { %v300_v27 = vmul.f32 1.442695, %v298_v26  ;;  %v1666_v30 = vpop.eup %1303 }
 0x3cc   :  { %v1087_v34 = vsel %vm142_vm1, %v1666_v30, 0.0 }
 0x3cd   :  { %1305 = vpow2.f32 %v300_v27  ;;  %825 = vadd.xlane.f32.xlu0 %v824_v28 }
 0x3d0   :  { %v1259_v29 = vpop.permute.xlu1 %1258 }
 0x3d1   :  { %v1260_v31 = vunpack.i.l.bf16 %v1259_v29  ;;  %v1261_v37 = vunpack.i.h.bf16 %v1259_v29 }
 0x3d3   :  { %v1668_v35 = vpop.eup %1305  ;;  %368 = vmatpush.msrb.mxu2 %v1260_v31 }
 0x3d4   :  { %v304_v39 = vsel %vm142_vm1, %v1668_v35, 0.0 }
 0x3d5   :  { %369 = vmatpush.msrb.mxu2 %v1261_v37  ;;  %1088 = vadd.xlane.f32.xlu0 %v1087_v34 }
 0x3d6   :  { %305 = vadd.xlane.f32.xlu1 %v304_v39 }
 0x3d7   :  { %634 = vmatpush.msra.mxu2 %v1265_v38 }
 0x3d9   :  { %635 = vmatpush.msra.mxu2 %v1266_v36 }
 0x3f1   :  { %v297_v40 = vpop.xlane.xlu2 %296 }
 0x3f2   :  { %v299_v41 = vsub.f32 %v1620_v51, %v297_v40 }
 0x3f4   :  { %v302_v42 = vmul.f32 1.442695, %v299_v41 }
 0x3f6   :  { %1307 = vpow2.f32 %v302_v42 }
 0x3f9   :  { %v429_v43 = vpop.xlane.xlu2 %428 }
 0x3fa   :  { %v433_v44 = vsub.f32 %v1624_v52, %v429_v43 }
 0x3fb   :  { %v432_v45 = vpop.xlane.xlu1 %431 }
 0x3fc   :  { %v1676_v46 = vpop.eup %1307  ;;  %v435_v48 = vmul.f32 1.442695, %v433_v44  ;;  %v434_v50 = vsub.f32 %v1626_v19, %v432_v45  ;;  %v1080_v19 = vpop.xlane.xlu0 %1079 }
 0x3fd   :  { %v307_v53 = vsel %vm142_vm1, %v1676_v46, 0.0  ;;  %v1082_v9 = vsub.f32 %v1616_v49, %v1080_v19 }
 0x3fe   :  { %1309 = vpow2.f32 %v435_v48  ;;  %308 = vadd.xlane.f32.xlu1 %v307_v53  ;;  %v437_v54 = vmul.f32 1.442695, %v434_v50 }
 0x3ff   :  { %v1085_v13 = vmul.f32 1.442695, %v1082_v9 }
 0x400   :  { %1311 = vpow2.f32 %v437_v54 }
 0x401   :  { %v696_v1 = vpop.xlane.xlu2 %695 }
 0x404   :  { %v1681_v56 = vpop.eup %1309 }
 0x405   :  { %v439_v51 = vsel %vm142_vm1, %v1681_v56, 0.0 }
 0x406   :  { %440 = vadd.xlane.f32.xlu2 %v439_v51  ;;  %v1685_v52 = vpop.eup %1311 }
 0x407   :  { %v442_v57 = vsel %vm142_vm1, %v1685_v52, 0.0 }
 0x409   :  { %v945_v5 = vpop.xlane.xlu2 %944 }
 0x40a   :  { %v949_v17 = vsub.f32 %v1640_v58, %v945_v5 }
 0x40c   :  { %v951_v10 = vmul.f32 1.442695, %v949_v17 }
 0x40e   :  { %443 = vadd.xlane.f32.xlu2 %v442_v57 }
 0x411   :  { %v948_v11 = vpop.xlane.xlu2 %947 }
 0x417   :  { %1268 = vrot.lane.b32.xlu1 %v1611_v47, %s1439_s29  ;;  %v698_v47 = vsub.f32 %v1634_v55, %v696_v1 }
 0x419   :  { %v701_v4 = vmul.f32 1.442695, %v698_v47 }
 0x41b   :  { %1313 = vpow2.f32 %v701_v4 }
 0x41d   :  { %v1691_v59 = vpop.xlane.xlu0 %573 }
 0x41e   :  { %vm583_vm2 = vweird.f32 %v1691_v59  ;;  %v587_v9 = vand.u32 2147483647, %v1691_v59 }
 0x420   :  { %vm588_vm6 = vcmp.eq.f32.partialorder %v587_v9, 8.507059e+37 }
 0x421   :  { %v1711_v8 = vpop.eup %1313 }
 0x422   :  { %v706_v55 = vsel %vm142_vm1, %v1711_v8, 0.0 }
 0x425   :  { %v1704_v0 = vpop.xlane.xlu0 %576 }
 0x426   :  { %1273 = vrot.lane.b32.xlu2 %v1272_v63, %s1435_s26 }
 0x430   :  { %v1707_v2 = vpop.xlane.xlu0 %822 }
 0x438   :  { %v693_v32 = vpop.xlane.xlu0 %692 }
 0x439   :  { %v697_v7 = vsub.f32 %v1628_v20, %v693_v32  ;;  %v950_v20 = vsub.f32 %v1644_v60, %v948_v11  ;;  %v589_v32 = vand.u32 2147483648, %v1691_v59 }
 0x43b   :  { %v699_v33 = vmul.f32 1.442695, %v697_v7  ;;  %v953_v15 = vmul.f32 1.442695, %v950_v20 }
 0x43d   :  { %1315 = vpow2.f32 %v699_v33 }
 0x43e   :  { %1317 = vpow2.f32 %v951_v10 }
 0x43f   :  { %1319 = vpow2.f32 %v1085_v13 }
 0x440   :  { %v1749_v7 = vpop.xlane.xlu0 %825 }
 0x441   :  { %707 = vadd.xlane.f32.xlu1 %v706_v55 }
 0x443   :  { %v1716_v14 = vpop.eup %1315 }
 0x444   :  { %v703_v58 = vsel %vm142_vm1, %v1716_v14, 0.0  ;;  %v1721_v49 = vpop.eup %1317 }
 0x445   :  { %704 = vadd.xlane.f32.xlu0 %v703_v58  ;;  %v1723_v18 = vpop.eup %1319  ;;  %v955_v21 = vsel %vm142_vm1, %v1721_v49, 0.0 }
 0x446   :  { %v1090_v60 = vsel %vm142_vm1, %v1723_v18, 0.0 }
 0x449   :  { %v306_v16 = vpop.xlane.xlu1 %305 }
 0x44a   :  { %1321 = vrcp.f32 %v306_v16  ;;  %v321_v28 = vand.u32 2147483648, %v306_v16  ;;  %v319_v31 = vand.u32 2147483647, %v306_v16  ;;  %vm315_vm11 = vweird.f32 %v306_v16 }
 0x44b   :  { %1323 = vpow2.f32 %v953_v15 }
 0x44c   :  { %v322_v38 = vor.u32 1.1754944e-38, %v321_v28  ;;  %vm320_vm13 = vcmp.eq.f32.partialorder %v319_v31, 8.507059e+37  ;;  %1325 = vrcp.f32 %v1691_v59 }
 0x44d   :  { %956 = vadd.xlane.f32.xlu0 %v955_v21  ;;  %1327 = vrcp.f32 %v1704_v0  ;;  %v590_v21 = vor.u32 1.1754944e-38, %v589_v32 }
 0x44f   :  { %1091 = vadd.xlane.f32.xlu2 %v1090_v60 }
 0x450   :  { %v1322_v22 = vpop.eup %1321 }
 0x451   :  { %v1729_v23 = vpop.eup %1323  ;;  %v311_v26 = vmul.f32 %v1322_v22, %v306_v16  ;;  %vm316_vm10 = vweird.f32 %v1322_v22 }
 0x452   :  { %v958_v29 = vsel %vm142_vm1, %v1729_v23, 0.0  ;;  %vm317_vm12 = vmor %vm315_vm11, %vm316_vm10  ;;  %v1326_v40 = vpop.eup %1325  ;;  %vm598_vm10 = vweird.f32 %v1704_v0 }
 0x453   :  { %v312_v27 = vsub.f32 1.0, %v311_v26  ;;  %v579_v42 = vmul.f32 %v1326_v40, %v1691_v59  ;;  %v1740_v44 = vpop.eup %1327  ;;  %vm584_vm15 = vweird.f32 %v1326_v40 }
 0x454   :  { %v594_v53 = vmul.f32 %v1740_v44, %v1704_v0  ;;  %vm1751_vm4 = vmor %vm583_vm2, %vm584_vm15  ;;  %vm599_vm8 = vweird.f32 %v1740_v44 }
 0x455   :  { %v313_v24 = vmul.f32 %v1322_v22, %v312_v27  ;;  %959 = vadd.xlane.f32.xlu0 %v958_v29  ;;  %v580_v43 = vsub.f32 1.0, %v579_v42  ;;  %v602_v42 = vand.u32 2147483647, %v1704_v0 }
 0x456   :  { %v595_v1 = vsub.f32 1.0, %v594_v53 }
 0x457   :  { %v314_v37 = vadd.f32 %v1322_v22, %v313_v24  ;;  %v581_v50 = vmul.f32 %v1326_v40, %v580_v43 }
 0x458   :  { %v596_v20 = vmul.f32 %v1740_v44, %v595_v1 }
 0x459   :  { %v318_v34 = vsel %vm317_vm12, %v1322_v22, %v314_v37 }
 0x45a   :  { %1283 = vrot.lane.b32.xlu1 %v1272_v63, %s1439_s29  ;;  %v323_v39 = vsel %vm320_vm13, %v322_v38, %v318_v34  ;;  %v597_v24 = vadd.f32 %v1740_v44, %v596_v20  ;;  %vm1784_vm13 = vmor %vm598_vm10, %vm599_vm8 }
 0x45b   :  { %v324_v36 = vmul.f32 %v1668_v35, %v323_v39 }
 0x45d   :  { %1206 = vmatmul.msk.f32.vlgmr.msrb.gmra.mxu2 %vm142_vm1, %v324_v36 }
 0x469   :  { %1278 = vrot.lane.b32.xlu0 %v1272_v63, %s1440_s30  ;;  %v582_v63 = vadd.f32 %v1326_v40, %v581_v50 }
 0x46b   :  { %v586_v13 = vsel %vm1751_vm4, %v1326_v40, %v582_v63 }
 0x46c   :  { %v591_v26 = vsel %vm588_vm6, %v590_v21, %v586_v13 }
 0x471   :  { %v309_v41 = vpop.xlane.xlu1 %308 }
 0x472   :  { %1329 = vrcp.f32 %v309_v41  ;;  %v336_v51 = vand.u32 2147483648, %v309_v41  ;;  %v334_v19 = vand.u32 2147483647, %v309_v41  ;;  %vm330_vm0 = vweird.f32 %v309_v41 }
 0x473   :  { %1331 = vrcp.f32 %v1707_v2 }
 0x474   :  { %v337_v17 = vor.u32 1.1754944e-38, %v336_v51  ;;  %vm335_vm5 = vcmp.eq.f32.partialorder %v334_v19, 8.507059e+37  ;;  %v601_v51 = vsel %vm1784_vm13, %v1740_v44, %v597_v24 }
 0x478   :  { %v1330_v45 = vpop.eup %1329 }
 0x479   :  { %v326_v35 = vmul.f32 %v1330_v45, %v309_v41  ;;  %v441_v48 = vpop.xlane.xlu2 %440  ;;  %vm331_vm14 = vweird.f32 %v1330_v45  ;;  %v1745_v47 = vpop.eup %1331 }
 0x47a   :  { %1333 = vrcp.f32 %v441_v48  ;;  %vm332_vm3 = vmor %vm330_vm0, %vm331_vm14  ;;  %v828_v15 = vmul.f32 %v1745_v47, %v1707_v2  ;;  %v456_v22 = vand.u32 2147483648, %v441_v48  ;;  %v454_v27 = vand.u32 2147483647, %v441_v48 }
 0x47b   :  { %v327_v54 = vsub.f32 1.0, %v326_v35  ;;  %vm450_vm9 = vweird.f32 %v441_v48  ;;  %v592_v35 = vmul.f32 %v1648_v3, %v591_v26  ;;  %vm603_vm0 = vcmp.eq.f32.partialorder %v602_v42, 8.507059e+37 }
 0x47c   :  { %v829_v28 = vsub.f32 1.0, %v828_v15  ;;  %v457_v34 = vor.u32 1.1754944e-38, %v456_v22  ;;  %vm455_vm12 = vcmp.eq.f32.partialorder %v454_v27, 8.507059e+37  ;;  %vm833_vm2 = vweird.f32 %v1745_v47  ;;  %v1825_v22 = vpop.xlane.xlu0 %1088 }
 0x47d   :  { %v328_v57 = vmul.f32 %v1330_v45, %v327_v54 }
 0x47e   :  { %v830_v50 = vmul.f32 %v1745_v47, %v829_v28 }
 0x47f   :  { %v329_v4 = vadd.f32 %v1330_v45, %v328_v57 }
 0x480   :  { %v1334_v5 = vpop.eup %1333 }
 0x481   :  { %v446_v10 = vmul.f32 %v1334_v5, %v441_v48  ;;  %v1756_v11 = vpop.xlane.xlu2 %443  ;;  %v333_v55 = vsel %vm332_vm3, %v1330_v45, %v329_v4  ;;  %vm451_vm7 = vweird.f32 %v1334_v5 }
 0x482   :  { %1335 = vrcp.f32 %v1756_v11  ;;  %v338_v58 = vsel %vm335_vm5, %v337_v17, %v333_v55  ;;  %vm1771_vm11 = vmor %vm450_vm9, %vm451_vm7  ;;  %v471_v57 = vand.u32 2147483648, %v1756_v11  ;;  %v469_v4 = vand.u32 2147483647, %v1756_v11 }
 0x483   :  { %1337 = vrcp.f32 %v1749_v7  ;;  %v447_v16 = vsub.f32 1.0, %v446_v10  ;;  %v339_v59 = vmul.f32 %v1676_v46, %v338_v58  ;;  %v604_v46 = vand.u32 2147483648, %v1704_v0 }
 0x484   :  { %vm465_vm15 = vweird.f32 %v1756_v11  ;;  %v472_v32 = vor.u32 1.1754944e-38, %v471_v57  ;;  %vm470_vm4 = vcmp.eq.f32.partialorder %v469_v4, 8.507059e+37  ;;  %v838_v10 = vand.u32 2147483648, %v1707_v2 }
 0x485   :  { %v448_v60 = vmul.f32 %v1334_v5, %v447_v16  ;;  %1207 = vmatmul.msk.f32.gmra.mxu2 %vm142_vm1, %v339_v59  ;;  %vm832_vm5 = vweird.f32 %v1707_v2  ;;  %v836_v55 = vand.u32 2147483647, %v1707_v2  ;;  %vm847_vm9 = vweird.f32 %v1749_v7 }
 0x486   :  { %vm834_vm6 = vmor %vm832_vm5, %vm833_vm2  ;;  %v839_v15 = vor.u32 1.1754944e-38, %v838_v10  ;;  %v851_v16 = vand.u32 2147483647, %v1749_v7 }
 0x487   :  { %v449_v29 = vadd.f32 %v1334_v5, %v448_v60  ;;  %vm837_vm7 = vcmp.eq.f32.partialorder %v836_v55, 8.507059e+37 }
 0x488   :  { %v1336_v31 = vpop.eup %1335 }
 0x489   :  { %v1775_v38 = vpop.eup %1337  ;;  %v461_v39 = vmul.f32 %v1336_v31, %v1756_v11  ;;  %v1274_v36 = vpop.permute.xlu2 %1273  ;;  %v453_v41 = vsel %vm1771_vm11, %v1334_v5, %v449_v29  ;;  %vm466_vm14 = vweird.f32 %v1336_v31  ;;  %v605_v5 = vor.u32 1.1754944e-38, %v604_v46 }
 0x48a   :  { %v1269_v40 = vpop.permute.xlu1 %1268  ;;  %v1275_v43 = vunpack.i.l.bf16 %v1274_v36  ;;  %v458_v54 = vsel %vm455_vm12, %v457_v34, %v453_v41  ;;  %v843_v0 = vmul.f32 %v1775_v38, %v1749_v7  ;;  %v1276_v3 = vunpack.i.h.bf16 %v1274_v36  ;;  %vm467_vm3 = vmor %vm465_vm15, %vm466_vm14 }
 0x48b   :  { %v1270_v45 = vunpack.i.l.bf16 %v1269_v40  ;;  %v462_v53 = vsub.f32 1.0, %v461_v39  ;;  %v1271_v19 = vunpack.i.h.bf16 %v1269_v40  ;;  %v459_v1 = vmul.f32 %v1681_v56, %v458_v54 }
 0x48c   :  { %885 = vmatpush.msrb.mxu2 %v1275_v43  ;;  %v606_v17 = vsel %vm603_vm0, %v605_v5, %v601_v51  ;;  %v831_v56 = vadd.f32 %v1745_v47, %v830_v50  ;;  %v844_v33 = vsub.f32 1.0, %v843_v0  ;;  %vm848_vm8 = vweird.f32 %v1775_v38 }
 0x48d   :  { %501 = vmatpush.msrb.mxu0 %v1270_v45  ;;  %v463_v63 = vmul.f32 %v1336_v31, %v462_v53  ;;  %1218 = vmatmul.msk.f32.vlgmr.msra.gmra.mxu2 %vm142_vm1, %v592_v35  ;;  %v607_v13 = vmul.f32 %v1652_v6, %v606_v17  ;;  %v853_v6 = vand.u32 2147483648, %v1749_v7  ;;  %vm849_vm10 = vmor %vm847_vm9, %vm848_vm8  ;;  %vm852_vm11 = vcmp.eq.f32.partialorder %v851_v16, 8.507059e+37 }
 0x48e   :  { %886 = vmatpush.msrb.mxu2 %v1276_v3  ;;  %v845_v20 = vmul.f32 %v1775_v38, %v844_v33 }
 0x48f   :  { %502 = vmatpush.msrb.mxu0 %v1271_v19  ;;  %v464_v44 = vadd.f32 %v1336_v31, %v463_v63  ;;  %v854_v59 = vor.u32 1.1754944e-38, %v853_v6  ;;  %v1104_v6 = vand.u32 2147483648, %v1825_v22 }
 0x490   :  { %1212 = vmatmul.msk.f32.vlgmr.msrb.gmra.mxu0 %vm142_vm1, %v459_v1  ;;  %v846_v2 = vadd.f32 %v1775_v38, %v845_v20 }
 0x491   :  { %759 = vmatpush.msra.mxu0 %v1699_v62  ;;  %v468_v9 = vsel %vm467_vm3, %v1336_v31, %v464_v44  ;;  %v835_v62 = vsel %vm834_vm6, %v1745_v47, %v831_v56 }
 0x492   :  { %v473_v11 = vsel %vm470_vm4, %v472_v32, %v468_v9 }
 0x493   :  { %760 = vmatpush.msra.mxu0 %v1695_v61  ;;  %v474_v58 = vmul.f32 %v1685_v52, %v473_v11  ;;  %v840_v61 = vsel %vm837_vm7, %v839_v15, %v835_v62  ;;  %v850_v52 = vsel %vm849_vm10, %v1775_v38, %v846_v2  ;;  %vm1098_vm10 = vweird.f32 %v1825_v22 }
 0x494   :  { %v841_v47 = vmul.f32 %v1656_v12, %v840_v61  ;;  %v855_v21 = vsel %vm852_vm11, %v854_v59, %v850_v52 }
 0x495   :  { %1219 = vmatmul.msk.f32.gmra.mxu2 %vm142_vm1, %v607_v13  ;;  %v856_v60 = vmul.f32 %v1662_v25, %v855_v21 }
 0x498   :  { %1213 = vmatmul.msk.f32.gmra.mxu0 %vm142_vm1, %v474_v58 }
 0x49d   :  { %1230 = vmatmul.msk.f32.vlgmr.msrb.gmra.mxu2 %vm142_vm1, %v841_v47  ;;  %v1102_v47 = vand.u32 2147483647, %v1825_v22 }
 0x4a5   :  { %1231 = vmatmul.msk.f32.gmra.mxu2 %vm142_vm1, %v856_v60  ;;  %v1105_v60 = vor.u32 1.1754944e-38, %v1104_v6 }
 0x4b4   :  { %v708_v26 = vpop.xlane.xlu1 %707 }
 0x4b5   :  { %1339 = vrcp.f32 %v708_v26  ;;  %v735_v53 = vand.u32 2147483648, %v708_v26  ;;  %vm729_vm2 = vweird.f32 %v708_v26  ;;  %v733_v57 = vand.u32 2147483647, %v708_v26 }
 0x4b7   :  { %v736_v4 = vor.u32 1.1754944e-38, %v735_v53  ;;  %vm734_vm4 = vcmp.eq.f32.partialorder %v733_v57, 8.507059e+37 }
 0x4b8   :  { %v705_v27 = vpop.xlane.xlu0 %704 }
 0x4b9   :  { %1341 = vrcp.f32 %v705_v27  ;;  %v718_v46 = vand.u32 2147483647, %v705_v27  ;;  %v720_v37 = vand.u32 2147483648, %v705_v27  ;;  %vm714_vm13 = vweird.f32 %v705_v27 }
 0x4ba   :  { %1343 = vrcp.f32 %v1825_v22 }
 0x4bb   :  { %v1340_v12 = vpop.eup %1339  ;;  %vm719_vm15 = vcmp.eq.f32.partialorder %v718_v46, 8.507059e+37  ;;  %v721_v42 = vor.u32 1.1754944e-38, %v720_v37 }
 0x4bc   :  { %v725_v7 = vmul.f32 %v1340_v12, %v708_v26  ;;  %vm730_vm0 = vweird.f32 %v1340_v12 }
 0x4bd   :  { %vm731_vm3 = vmor %vm729_vm2, %vm730_vm0 }
 0x4be   :  { %v726_v29 = vsub.f32 1.0, %v725_v7 }
 0x4bf   :  { %v1342_v28 = vpop.eup %1341 }
 0x4c0   :  { %v710_v24 = vmul.f32 %v1342_v28, %v705_v27  ;;  %v1828_v31 = vpop.xlane.xlu0 %956  ;;  %v727_v38 = vmul.f32 %v1340_v12, %v726_v29  ;;  %vm715_vm12 = vweird.f32 %v1342_v28  ;;  %v1833_v36 = vpop.eup %1343 }
 0x4c1   :  { %1345 = vrcp.f32 %v1828_v31  ;;  %vm716_vm14 = vmor %vm714_vm13, %vm715_vm12  ;;  %v1094_v50 = vmul.f32 %v1833_v36, %v1825_v22  ;;  %v972_v10 = vand.u32 2147483648, %v1828_v31  ;;  %vm966_vm6 = vweird.f32 %v1828_v31 }
 0x4c2   :  { %v711_v25 = vsub.f32 1.0, %v710_v24  ;;  %v1831_v39 = vpop.xlane.xlu2 %1091  ;;  %v728_v48 = vadd.f32 %v1340_v12, %v727_v38  ;;  %v970_v55 = vand.u32 2147483647, %v1828_v31  ;;  %vm1099_vm8 = vweird.f32 %v1833_v36 }
 0x4c3   :  { %1347 = vrcp.f32 %v1831_v39  ;;  %v1095_v1 = vsub.f32 1.0, %v1094_v50  ;;  %v973_v61 = vor.u32 1.1754944e-38, %v972_v10  ;;  %vm1100_vm11 = vmor %vm1098_vm10, %vm1099_vm8  ;;  %v1117_v37 = vand.u32 2147483647, %v1831_v39 }
 0x4c4   :  { %v712_v34 = vmul.f32 %v1342_v28, %v711_v25  ;;  %v732_v63 = vsel %vm731_vm3, %v1340_v12, %v728_v48  ;;  %vm971_vm9 = vcmp.eq.f32.partialorder %v970_v55, 8.507059e+37  ;;  %vm1113_vm3 = vweird.f32 %v1831_v39 }
 0x4c5   :  { %v737_v56 = vsel %vm734_vm4, %v736_v4, %v732_v63  ;;  %v1096_v9 = vmul.f32 %v1833_v36, %v1095_v1 }
 0x4c6   :  { %v713_v40 = vadd.f32 %v1342_v28, %v712_v34  ;;  %v738_v62 = vmul.f32 %v1711_v8, %v737_v56 }
 0x4c7   :  { %v1346_v41 = vpop.eup %1345  ;;  %v1097_v15 = vadd.f32 %v1833_v36, %v1096_v9 }
 0x4c8   :  { %v717_v43 = vsel %vm716_vm14, %v1342_v28, %v713_v40  ;;  %v962_v45 = vmul.f32 %v1346_v41, %v1828_v31  ;;  %v1837_v35 = vpop.xlane.xlu0 %959  ;;  %vm967_vm5 = vweird.f32 %v1346_v41  ;;  %vm1103_vm14 = vcmp.eq.f32.partialorder %v1102_v47, 8.507059e+37 }
 0x4c9   :  { %v722_v54 = vsel %vm719_vm15, %v721_v42, %v717_v43  ;;  %1349 = vrcp.f32 %v1837_v35  ;;  %v1844_v44 = vpop.eup %1347  ;;  %vm968_vm7 = vmor %vm966_vm6, %vm967_vm5  ;;  %v1101_v52 = vsel %vm1100_vm11, %v1833_v36, %v1097_v15  ;;  %v987_v21 = vand.u32 2147483648, %v1837_v35 }
 0x4ca   :  { %v963_v51 = vsub.f32 1.0, %v962_v45  ;;  %v723_v0 = vmul.f32 %v1716_v14, %v722_v54  ;;  %v1109_v11 = vmul.f32 %v1844_v44, %v1831_v39  ;;  %vm981_vm13 = vweird.f32 %v1837_v35 }
 0x4cb   :  { %v985_v27 = vand.u32 2147483647, %v1837_v35  ;;  %v1106_v22 = vsel %vm1103_vm14, %v1105_v60, %v1101_v52  ;;  %v988_v29 = vor.u32 1.1754944e-38, %v987_v21  ;;  %vm1114_vm0 = vweird.f32 %v1844_v44 }
 0x4cc   :  { %v964_v3 = vmul.f32 %v1346_v41, %v963_v51  ;;  %v1284_v19 = vpop.permute.xlu1 %1283  ;;  %1224 = vmatmul.msk.f32.vlgmr.msra.gmra.mxu0 %vm142_vm1, %v723_v0  ;;  %v1110_v2 = vsub.f32 1.0, %v1109_v11  ;;  %v1119_v31 = vand.u32 2147483648, %v1831_v39  ;;  %vm1115_vm4 = vmor %vm1113_vm3, %vm1114_vm0  ;;  %vm1118_vm5 = vcmp.eq.f32.partialorder %v1117_v37, 8.507059e+37 }
 0x4cd   :  { %v1285_v5 = vunpack.i.l.bf16 %v1284_v19  ;;  %v1286_v17 = vunpack.i.h.bf16 %v1284_v19  ;;  %vm986_vm2 = vcmp.eq.f32.partialorder %v985_v27, 8.507059e+37  ;;  %vm385_vm6 = vcmask 261248  }
 0x4ce   :  { %v965_v33 = vadd.f32 %v1346_v41, %v964_v3  ;;  %v1111_v59 = vmul.f32 %v1844_v44, %v1110_v2  ;;  %v1120_v36 = vor.u32 1.1754944e-38, %v1119_v31 }
 0x4cf   :  { %v1350_v32 = vpop.eup %1349  ;;  %1017 = vmatpush.msrb.mxu0 %v1285_v5 }
 0x4d0   :  { %v977_v14 = vmul.f32 %v1350_v32, %v1837_v35  ;;  %v969_v20 = vsel %vm968_vm7, %v1346_v41, %v965_v33  ;;  %vm982_vm12 = vweird.f32 %v1350_v32  ;;  %v1112_v24 = vadd.f32 %v1844_v44, %v1111_v59 }
 0x4d1   :  { %1018 = vmatpush.msrb.mxu0 %v1286_v17  ;;  %v974_v16 = vsel %vm971_vm9, %v973_v61, %v969_v20  ;;  %vm983_vm15 = vmor %vm981_vm13, %vm982_vm12  ;;  %vm518_vm7 = vcmask 392448  }
 0x4d2   :  { %v978_v13 = vsub.f32 1.0, %v977_v14  ;;  %v975_v26 = vmul.f32 %v1721_v49, %v974_v16  ;;  %v1107_v49 = vmul.f32 %v1666_v30, %v1106_v22  ;;  %v1116_v34 = vsel %vm1115_vm4, %v1844_v44, %v1112_v24 }
 0x4d3   :  { %v1121_v41 = vsel %vm1118_vm5, %v1120_v36, %v1116_v34 }
 0x4d4   :  { %v979_v58 = vmul.f32 %v1350_v32, %v978_v13  ;;  %1225 = vmatmul.msk.f32.gmra.mxu0 %vm142_vm1, %v738_v62  ;;  %v1122_v30 = vmul.f32 %v1723_v18, %v1121_v41 }
 0x4d6   :  { %v980_v8 = vadd.f32 %v1350_v32, %v979_v58 }
 0x4d8   :  { %v984_v28 = vsel %vm983_vm15, %v1350_v32, %v980_v8 }
 0x4d9   :  { %v989_v46 = vsel %vm986_vm2, %v988_v29, %v984_v28 }
 0x4da   :  { %v990_v40 = vmul.f32 %v1729_v23, %v989_v46 }
 0x4db   :  { %v1279_v12 = vpop.permute.xlu0 %1278 }
 0x4dc   :  { %v1280_v7 = vunpack.i.l.bf16 %v1279_v12  ;;  %1236 = vmatmul.msk.f32.vlgmr.msrb.gmra.mxu0 %vm142_vm1, %v975_v26  ;;  %v1281_v25 = vunpack.i.h.bf16 %v1279_v12 }
 0x4de   :  { %1149 = vmatpush.msra.mxu2 %v1280_v7 }
 0x4e0   :  { %v371_v38 = vpop.f32.mrf.mxu2  ;;  %1150 = vmatpush.msra.mxu2 %v1281_v25 }
 0x4e1   :  { %379 = vrot.lane.b32.xlu0 %v371_v38, %s1434_s0  ;;  %1242 = vmatmul.msk.f32.vlgmr.msra.gmra.mxu2 %vm142_vm1, %v1107_v49 }
 0x4e4   :  { %1237 = vmatmul.msk.f32.gmra.mxu0 %vm142_vm1, %v990_v40 }
 0x4e9   :  { %1243 = vmatmul.msk.f32.gmra.mxu2 %vm142_vm1, %v1122_v30 }
 0x508   :  { %v374_v39 = vpop.f32.mrf.mxu2 }
 0x509   :  { %381 = vrot.lane.b32.xlu0 %v374_v39, %s1434_s0 }
 0x50d   :  { %v504_v42 = vpop.f32.mrf.mxu0 }
 0x50e   :  { %512 = vrot.lane.b32.xlu2 %v504_v42, %s1438_s2 }
 0x510   :  { %v637_v43 = vpop.f32.mrf.mxu2 }
 0x511   :  { %645 = vrot.lane.b32.xlu1 %v637_v43, %s1437_s28 }
 0x515   :  { %v507_v45 = vpop.f32.mrf.mxu0 }
 0x516   :  { %514 = vrot.lane.b32.xlu0 %v507_v45, %s1438_s2 }
 0x518   :  { %v640_v23 = vpop.f32.mrf.mxu2 }
 0x51e   :  { %647 = vrot.lane.b32.xlu0 %v640_v23, %s1437_s28 }
 0x520   :  { %v888_v35 = vpop.f32.mrf.mxu2 }
 0x521   :  { %896 = vrot.lane.b32.xlu1 %v888_v35, %s1434_s0 }
 0x528   :  { %v891_v18 = vpop.f32.mrf.mxu2 }
 0x529   :  { %898 = vrot.lane.b32.xlu0 %v891_v18, %s1434_s0 }
 0x549   :  { %v762_v48 = vpop.f32.mrf.mxu0 }
 0x54a   :  { %768 = vst.msk [vmem:[#allocation7 + $0x10] sm:$0xff] %vm142_vm1, %v762_v48 }
 0x551   :  { %v765_v50 = vpop.f32.mrf.mxu0 }
 0x552   :  { %769 = vst.msk [vmem:[#allocation7 + $0x18] sm:$0xff] %vm142_vm1, %v765_v50  ;;  %vm651_vm1 = vcmask 523648  }
 0x553   :  { %v380_v53 = vpop.permute.xlu0 %379 }
 0x554   :  { %386 = vst.msk [vmem:[#allocation7] sm:$0xff] %vm385_vm6, %v380_v53 }
 0x559   :  { %v1020_v54 = vpop.f32.mrf.mxu0 }
 0x55a   :  { %1028 = vrot.lane.b32.xlu1 %v1020_v54, %s1438_s2 }
 0x561   :  { %v1023_v51 = vpop.f32.mrf.mxu0 }
 0x562   :  { %1030 = vrot.lane.b32.xlu2 %v1023_v51, %s1438_s2 }
 0x564   :  { %v1152_v0 = vpop.f32.mrf.mxu2 }
 0x565   :  { %1160 = vrot.lane.b32.xlu0 %v1152_v0, %s1437_s28 }
 0x568   :  { %v513_v57 = vpop.permute.xlu2 %512 }
 0x569   :  { %519 = vst.msk [vmem:[#allocation7] sm:$0xff] %vm518_vm7, %v513_v57 }
 0x56c   :  { %v1155_v3 = vpop.f32.mrf.mxu2 }
 0x56d   :  { %1162 = vrot.lane.b32.xlu1 %v1155_v3, %s1437_s28 }
 0x57b   :  { %v382_v19 = vpop.permute.xlu0 %381 }
 0x57c   :  { %387 = vst.msk [vmem:[#allocation7 + $0x8] sm:$0xff] %vm385_vm6, %v382_v19 }
 0x583   :  { %v646_v63 = vpop.permute.xlu1 %645 }
 0x584   :  { %652 = vst.msk [vmem:[#allocation7] sm:$0xff] %vm651_vm1, %v646_v63 }
 0x588   :  { %v515_v1 = vpop.permute.xlu0 %514 }
 0x589   :  { %520 = vst.msk [vmem:[#allocation7 + $0x8] sm:$0xff] %vm518_vm7, %v515_v1 }
 0x590   :  { %v648_v4 = vpop.permute.xlu0 %647 }
 0x591   :  { %653 = vst.msk [vmem:[#allocation7 + $0x8] sm:$0xff] %vm651_vm1, %v648_v4 }
 0x593   :  { %v897_v5 = vpop.permute.xlu1 %896 }
 0x594   :  { %902 = vst.msk [vmem:[#allocation7 + $0x10] sm:$0xff] %vm385_vm6, %v897_v5 }
 0x59b   :  { %v899_v44 = vpop.permute.xlu0 %898 }
 0x59c   :  { %903 = vst.msk [vmem:[#allocation7 + $0x18] sm:$0xff] %vm385_vm6, %v899_v44 }
 0x5bc   :  { %v1031_v32 = vpop.permute.xlu2 %1030 }
 0x5bd   :  { %1035 = vst.msk [vmem:[#allocation7 + $0x18] sm:$0xff] %vm518_vm7, %v1031_v32 }
 0x5cc   :  { %v1029_v17 = vpop.permute.xlu1 %1028 }
 0x5cd   :  { %1034 = vst.msk [vmem:[#allocation7 + $0x10] sm:$0xff] %vm518_vm7, %v1029_v17 }
 0x5d7   :  { %v1161_v56 = vpop.permute.xlu0 %1160 }
 0x5d8   :  { %1166 = vst.msk [vmem:[#allocation7 + $0x10] sm:$0xff] %vm651_vm1, %v1161_v56 }
 0x5df   :  { %v1163_v33 = vpop.permute.xlu1 %1162 }
 0x5e0   :  { %1167 = vst.msk [vmem:[#allocation7 + $0x18] sm:$0xff] %vm651_vm1, %v1163_v33 }
 0x5e1   :  { %1180 = dma.vmem_to_hbm [thread:$0]  %s1173_s5, 512, %s1175_s8, [#allocation4], %s1430_s20, %s1430_s20, %s1431_s21  }
 0x5e2   :  { %1427 = dma.done.wait [#allocation4], 512  }
 0x5e3   :  { %1428 = vsyncadd [#allocation4], 4294966784 }
 0x5e4   :  { %1185 = vsyncpa [#allocation3], 1 }
 0x5e5   :  { %1186 = vsyncpa [#allocation6], 1 }
 0x5e6   :  { %1187 = vsyncpa [#allocation4], 1 }

</bundles_post_ra>
